<compile_context>
chip_gen: v7x
topology: tpu7x:2x2x1
jax: 0.10.0
libtpu: 0.0.40
codegen_flags: <defaults>
</compile_context>

<pallas_src>
import functools

import jax
import jax.numpy as jnp
from jax.experimental import pallas as pl
from jax.experimental.pallas import tpu as pltpu


# ----------------------------- kernel body ----------------------------------

def _h_sigmoid_kernel(x_ref, o_ref):
    # HBM-bound elementwise op: upcast to f32 for the math (free VPU slack),
    # store back in the output dtype. `/ 6.0` matches relu6(x+3)/6 exactly.
    x = x_ref[...].astype(jnp.float32)
    y = jnp.clip(x + 3.0, 0.0, 6.0) / 6.0
    o_ref[...] = y.astype(o_ref.dtype)


def _h_sigmoid_xla(x):
    """Plain-XLA fallback (tiny inputs / ragged tail / non-float dtypes)."""
    y = jnp.clip(x.astype(jnp.float32) + 3.0, 0.0, 6.0) / 6.0
    return y.astype(x.dtype) if jnp.issubdtype(x.dtype, jnp.floating) else y


# ----------------------------- helpers ---------------------------------------

def _round_up(a: int, m: int) -> int:
    return -(-a // m) * m


@functools.lru_cache(maxsize=None)
def _chip_params():
    """Returns (target_tile_bytes, vmem_limit_bytes, two_tensorcores)."""
    try:
        kind = jax.devices()[0].device_kind.lower()
    except Exception:  # pragma: no cover
        kind = ""
    if "v7" in kind or "tpu7" in kind:
        # v7x: ~3.2 TB/s HBM, 64 MiB VMEM per TC, 2 TCs/chip.
        return 6 * 1024 * 1024, 40 * 1024 * 1024, True
    if "v6" in kind:
        # v6e: ~1.4 TB/s HBM, 128 MiB VMEM, 1 TC.
        return 4 * 1024 * 1024, 48 * 1024 * 1024, False
    # v5e and everything else: slower HBM, 128 MiB VMEM, 16 MiB default scoped
    # limit (so we must raise it explicitly even for 3 MiB tiles).
    return 3 * 1024 * 1024, 40 * 1024 * 1024, False


_MIN_PALLAS_BYTES = 512 * 1024          # below this, XLA fused op wins
_WIDTHS = (8192, 4096, 2048, 1024, 512, 256, 128)


def _tile_rows(rows, C, itemsize, sub, target_tile_bytes, two_cores):
    """Pick block row-count: ~target_tile_bytes per input block, multiple of `sub`."""
    row_bytes = C * itemsize
    max_tile = max(sub, (target_tile_bytes // row_bytes) // sub * sub)
    if rows <= max_tile:
        if two_cores and rows > sub:
            # Split into (at least) 2 blocks so dimension_semantics=("parallel",)
            # can shard across both v7x TensorCores.
            return max(sub, _round_up(_round_up(rows, 2) // 2, sub))
        return rows                      # single block == full array dim (always legal)
    return max_tile                      # many blocks; ragged last block is fine


def _run_slab(slab):
    """Run the kernel over a lane-dense (rows, C) slab (C a multiple of 128)."""
    rows, C = slab.shape
    itemsize = jnp.dtype(slab.dtype).itemsize
    sub = {4: 8, 2: 16, 1: 32}.get(itemsize, 8)
    target_tile_bytes, vmem_limit, two_cores = _chip_params()
    tr = _tile_rows(rows, C, itemsize, sub, target_tile_bytes, two_cores)
    n = rows * C
    return pl.pallas_call(
        _h_sigmoid_kernel,
        out_shape=jax.ShapeDtypeStruct((rows, C), slab.dtype),
        grid_spec=pltpu.PrefetchScalarGridSpec(
            num_scalar_prefetch=0,
            grid=(pl.cdiv(rows, tr),),
            in_specs=[pl.BlockSpec((tr, C), lambda i: (i, 0))],
            out_specs=pl.BlockSpec((tr, C), lambda i: (i, 0)),
        ),
        compiler_params=pltpu.CompilerParams(
            dimension_semantics=("parallel",),
            vmem_limit_bytes=vmem_limit),
        cost_estimate=pl.CostEstimate(
            flops=4 * n, transcendentals=0, bytes_accessed=2 * n * itemsize),
    )(slab)


# ----------------------------- public wrapper --------------------------------

def h_sigmoid(x: jax.Array) -> jax.Array:
    """h_sigmoid over an arbitrarily-shaped array (NCHW expected)."""
    orig_shape = x.shape
    dtype = x.dtype
    n = int(x.size)
    if n == 0:
        return x
    if not jnp.issubdtype(dtype, jnp.floating):
        # PyTorch's `/ 6` on an integer tensor returns float anyway.
        return _h_sigmoid_xla(x)

    itemsize = jnp.dtype(dtype).itemsize
    if n * itemsize < _MIN_PALLAS_BYTES:
        # Tiny tensors: Pallas launch/pipeline setup dominates -> plain XLA.
        return _h_sigmoid_xla(x)

    sub = {4: 8, 2: 16, 1: 32}.get(itemsize, 8)
    _, _, two_cores = _chip_params()
    flat = x.reshape(-1)                 # contiguous view, free

    # --- choose slab width C: widest multiple of 128 that divides n exactly ---
    min_rows = 2 * sub if two_cores else sub
    C = None
    for c in _WIDTHS:
        if n % c == 0 and (n // c) >= min_rows:
            C = c
            break
    if C is None:
        for c in _WIDTHS:
            if n % c == 0:
                C = c
                break

    if C is not None:
        # Zero-copy path (the common NCHW case): reshape is a view.
        out = _run_slab(flat.reshape(n // C, C))
        return out.reshape(orig_shape)

    # --- ragged: n not a multiple of 128 (rare) ---
    # Run the kernel on the bulk and do the (< C element) tail with XLA.
    # No whole-array pad / slice copies.
    C = 128
    for c in _WIDTHS:
        if n // c >= sub:
            C = c
            break
    n_bulk = (n // C) * C
    bulk = _run_slab(flat[:n_bulk].reshape(n_bulk // C, C))
    tail = _h_sigmoid_xla(flat[n_bulk:])
    return jnp.concatenate([bulk.reshape(-1), tail]).reshape(orig_shape)


def h_sigmoid_ref(x: jax.Array) -> jax.Array:
    return jnp.clip(x + 3.0, 0.0, 6.0) / 6.0


# ----------------------------- self-test --------------------------------------

if __name__ == "__main__":
    key = jax.random.PRNGKey(0)
    k1, k2, k3 = jax.random.split(key, 3)

    # Module-typical small NCHW input (8 KiB): XLA fast path.
    x1 = jax.random.normal(k1, (2, 4, 16, 16), dtype=jnp.float32) * 4.0
    y1 = jax.block_until_ready(h_sigmoid(x1))
    assert y1.shape == x1.shape and y1.dtype == x1.dtype
    assert jnp.allclose(y1, h_sigmoid_ref(x1), atol=1e-6, rtol=1e-6), "mismatch (small)"

    # 1 MiB NCHW input: exercises the zero-copy Pallas slab path (n % 8192 == 0).
    x2 = jax.random.normal(k2, (2, 32, 64, 64), dtype=jnp.float32) * 4.0
    y2 = jax.block_until_ready(h_sigmoid(x2))
    assert jnp.allclose(y2, h_sigmoid_ref(x2), atol=1e-6, rtol=1e-6), "mismatch (slab)"

    # Ragged element count (n % 128 != 0, > 512 KiB): bulk kernel + XLA tail.
    x3 = jax.random.normal(k3, (2, 3, 181, 241), dtype=jnp.float32) * 4.0
    y3 = jax.block_until_ready(h_sigmoid(x3))
    assert jnp.allclose(y3, h_sigmoid_ref(x3), atol=1e-6, rtol=1e-6), "mismatch (ragged)"

    # bf16 storage: kernel computes in f32 internally, stores bf16.
    x4 = (jax.random.normal(k1, (1, 64, 64, 64), dtype=jnp.float32) * 4.0
          ).astype(jnp.bfloat16)
    y4 = jax.block_until_ready(h_sigmoid(x4))
    assert y4.dtype == jnp.bfloat16
    assert jnp.allclose(y4.astype(jnp.float32),
                        h_sigmoid_ref(x4.astype(jnp.float32)),
                        atol=1e-2, rtol=1e-2), "mismatch (bf16)"

    print("KERNEL_OK")
</pallas_src>

<mosaic_0001>
module attributes {stable_mosaic.version = 11 : i64} {
  func.func @_h_sigmoid_kernel(%arg0: i32, %arg1: memref<32x8192xf32, #tpu.memory_space<vmem>>, %arg2: memref<32x8192xf32, #tpu.memory_space<vmem>>) attributes {dimension_semantics = [#tpu.dimension_semantics<parallel>], iteration_bounds = array<i64: 1>, scalar_prefetch = 0 : i64, scratch_operands = 0 : i64, tpu.core_type = #tpu.core_type<tc>, window_params = [{transform_indices = @transform_0, window_bounds = array<i64: 32, 8192>}, {transform_indices = @transform_1, window_bounds = array<i64: 32, 8192>}]} {
    %c0 = arith.constant 0 : index
    %c0_0 = arith.constant 0 : index
    %0 = vector.load %arg1[%c0, %c0_0] : memref<32x8192xf32, #tpu.memory_space<vmem>>, vector<32x8192xf32>
    %cst = arith.constant 3.000000e+00 : f32
    %1 = vector.broadcast %cst : f32 to vector<32x8192xf32>
    %2 = arith.addf %0, %1 : vector<32x8192xf32>
    %cst_1 = arith.constant 0.000000e+00 : f32
    %cst_2 = arith.constant 6.000000e+00 : f32
    %3 = vector.broadcast %cst_1 : f32 to vector<32x8192xf32>
    %4 = arith.maximumf %3, %2 : vector<32x8192xf32>
    %5 = vector.broadcast %cst_2 : f32 to vector<32x8192xf32>
    %6 = arith.minimumf %5, %4 : vector<32x8192xf32>
    %cst_3 = arith.constant 6.000000e+00 : f32
    %7 = vector.broadcast %cst_3 : f32 to vector<32x8192xf32>
    %8 = arith.divf %6, %7 : vector<32x8192xf32>
    %c0_4 = arith.constant 0 : index
    %c0_5 = arith.constant 0 : index
    %9 = vector.load %arg2[%c0_4, %c0_5] : memref<32x8192xf32, #tpu.memory_space<vmem>>, vector<32x8192xf32>
    tpu.vector_store %arg2[%c0_4, %c0_5], %8 {strides = array<i32>} : memref<32x8192xf32, #tpu.memory_space<vmem>>, vector<32x8192xf32>,
    return
  }
  func.func @transform_0(%arg0: i32) -> (i32, i32) {
    %c0_i32 = arith.constant 0 : i32
    %c0_i32_0 = arith.constant 0 : i32
    return %arg0, %c0_i32 : i32, i32
  }
  func.func @transform_1(%arg0: i32) -> (i32, i32) {
    %c0_i32 = arith.constant 0 : i32
    %c0_i32_0 = arith.constant 0 : i32
    return %arg0, %c0_i32 : i32, i32
  }
}

</mosaic_0001>

<bundles_post_ra>
// kernel: tpu_custom_call.1
= control target key start
LH: loop header
LB: loop body
LE: loop exit
PB: predicated region body
PF: predicated region fallthrough
CT: control target
= control target key end

     0   :  { %6 = vsyncpa [#allocation3], 0  ;;  %s1673_s0 = inlined_call_operand.hbm [shape: f32[32,8192], index: 0, kind: input, shape index: {}]   ;;  %s1674_s1 = inlined_call_operand.hbm [shape: f32[32,8192], index: 1, kind: output, shape index: {}]  }
   0x1   :  { %7 = vsyncpa [#allocation4], 0  ;;  %s1629_s6 = smov [#allocation2]   ;;  %s1581_s10 = scalar_lea.hbm %s1673_s0, 32768 }
   0x2   :  { %s13_s7 = sshll.u32 %s1629_s6, 4  ;;  %p1582_p0 = scmp.ne.s32.totalorder %s1673_s0, %s1581_s10  ;;  %s14_s7 = int_to_ptr.vmem [resolvable:$true] %s13_s7 }
   0x3   :  { %p1585_p1 = scmp.lt.u32.totalorder %s1581_s10, %s1673_s0 }
   0x5   :  { %p1587_p2 = pnand %p1585_p1, %p1582_p0 }
   0x7   :  { %1590 = shalt.err (!%p1587_p2)
}
   0x8   :  { %s1591_s15 = scalar_lea.vmem %s14_s7, 32768  ;;  %p1596_p4 = scmp.lt.s32.totalorder %s14_s7, %s14_s7 }
   0x9   :  { %p1592_p3 = scmp.ne.s32.totalorder %s14_s7, %s1591_s15  ;;  %p1597_p5 = scmp.lt.s32.totalorder %s1591_s15, %s1591_s15 }
   0xb   :  { %p1598_p6 = por %p1597_p5, %p1596_p4 }
   0xd   :  { %p1599_p7 = pnand %p1598_p6, %p1592_p3 }
   0xf   :  { %1602 = shalt.err (!%p1599_p7)
}
  0x10   :  { %s1630_s16 = smov 8192   ;;  %s1631_s17 = smov 512  }
  0x11   :  { %19 = dma.hbm_to_vmem [thread:$0]  %s1673_s0, 32768, %s14_s7, [#allocation3], %s1630_s16, %s1630_s16, %s1631_s17  }
  0x12   :  { %1625 = dma.done.wait [#allocation3], 32768  }
  0x13   :  { %1626 = vsyncadd [#allocation3], 4294934528  ;;  %v23_v0 = vld [vmem:[#allocation2] sm:$0xff]  ;;  %v24_v1 = vld [vmem:[#allocation2 + $0x8] sm:$0xff]  ;;  %s1632_s0 = smov [#allocation5]  }
  0x14   :  { %v25_v2 = vld [vmem:[#allocation2 + $0x10] sm:$0xff]  ;;  %v279_v3 = vadd.f32 3.0, %v23_v0  ;;  %v280_v4 = vadd.f32 3.0, %v24_v1  ;;  %v26_v6 = vld [vmem:[#allocation2 + $0x18] sm:$0xff]  ;;  %v27_v7 = vld [vmem:[#allocation2 + $0x20] sm:$0xff]  ;;  %s1565_s20 = sshll.u32 %s1632_s0, 4  ;;  %s1566_s20 = int_to_ptr.vmem [resolvable:$true] %s1565_s20 }
  0x15   :  { %v281_v5 = vadd.f32 3.0, %v25_v2  ;;  %v28_v8 = vld [vmem:[#allocation2 + $0x28] sm:$0xff]  ;;  %v282_v9 = vadd.f32 3.0, %v26_v6  ;;  %v283_v10 = vadd.f32 3.0, %v27_v7  ;;  %v29_v12 = vld [vmem:[#allocation2 + $0x30] sm:$0xff]  ;;  %v30_v13 = vld [vmem:[#allocation2 + $0x38] sm:$0xff]  ;;  %p1608_p9 = scmp.lt.s32.totalorder %s1566_s20, %s1566_s20 }
  0x16   :  { %v284_v11 = vadd.f32 3.0, %v28_v8  ;;  %v535_v14 = vmax.f32 %v279_v3, 0.0  ;;  %v536_v15 = vmax.f32 %v280_v4, 0.0  ;;  %v285_v17 = vadd.f32 3.0, %v29_v12  ;;  %v31_v22 = vld [vmem:[#allocation2 + $0x40] sm:$0xff]  ;;  %v32_v23 = vld [vmem:[#allocation2 + $0x48] sm:$0xff] }
  0x17   :  { %v537_v16 = vmax.f32 %v281_v5, 0.0  ;;  %v538_v18 = vmax.f32 %v282_v9, 0.0  ;;  %v539_v19 = vmax.f32 %v283_v10, 0.0  ;;  %v286_v21 = vadd.f32 3.0, %v30_v13  ;;  %v33_v28 = vld [vmem:[#allocation2 + $0x50] sm:$0xff]  ;;  %v34_v29 = vld [vmem:[#allocation2 + $0x58] sm:$0xff] }
  0x18   :  { %v540_v20 = vmax.f32 %v284_v11, 0.0  ;;  %v791_v24 = vmin.f32 %v535_v14, 6.0  ;;  %v792_v25 = vmin.f32 %v536_v15, 6.0  ;;  %v541_v27 = vmax.f32 %v285_v17, 0.0  ;;  %v35_v34 = vld [vmem:[#allocation2 + $0x60] sm:$0xff]  ;;  %v36_v35 = vld [vmem:[#allocation2 + $0x68] sm:$0xff] }
  0x19   :  { %v793_v26 = vmin.f32 %v537_v16, 6.0  ;;  %v794_v30 = vmin.f32 %v538_v18, 6.0  ;;  %v795_v31 = vmin.f32 %v539_v19, 6.0  ;;  %v542_v33 = vmax.f32 %v286_v21, 0.0  ;;  %v37_v50 = vld [vmem:[#allocation2 + $0x70] sm:$0xff]  ;;  %v38_v51 = vld [vmem:[#allocation2 + $0x78] sm:$0xff] }
  0x1a   :  { %v796_v32 = vmin.f32 %v540_v20, 6.0  ;;  %v1048_v36 = vmul.f32 0.16666667, %v791_v24  ;;  %v1049_v37 = vmul.f32 0.16666667, %v792_v25  ;;  %v797_v42 = vmin.f32 %v541_v27, 6.0 }
  0x1b   :  { %v1050_v38 = vmul.f32 0.16666667, %v793_v26  ;;  %v1051_v39 = vmul.f32 0.16666667, %v794_v30  ;;  %v1052_v40 = vmul.f32 0.16666667, %v795_v31 }
  0x1c   :  { %v1053_v41 = vmul.f32 0.16666667, %v796_v32  ;;  %1304 = vst [vmem:[#allocation5] sm:$0xff] %v1048_v36  ;;  %1305 = vst [vmem:[#allocation5 + $0x8] sm:$0xff] %v1049_v37  ;;  %v798_v43 = vmin.f32 %v542_v33, 6.0  ;;  %v287_v44 = vadd.f32 3.0, %v31_v22 }
  0x1d   :  { %1306 = vst [vmem:[#allocation5 + $0x10] sm:$0xff] %v1050_v38  ;;  %v288_v45 = vadd.f32 3.0, %v32_v23  ;;  %1307 = vst [vmem:[#allocation5 + $0x18] sm:$0xff] %v1051_v39  ;;  %v289_v46 = vadd.f32 3.0, %v33_v28  ;;  %v290_v47 = vadd.f32 3.0, %v34_v29  ;;  %v291_v48 = vadd.f32 3.0, %v35_v34 }
  0x1e   :  { %1308 = vst [vmem:[#allocation5 + $0x20] sm:$0xff] %v1052_v40  ;;  %1309 = vst [vmem:[#allocation5 + $0x28] sm:$0xff] %v1053_v41  ;;  %v292_v49 = vadd.f32 3.0, %v36_v35  ;;  %v1054_v52 = vmul.f32 0.16666667, %v797_v42  ;;  %v543_v54 = vmax.f32 %v287_v44, 0.0 }
  0x1f   :  { %v1055_v53 = vmul.f32 0.16666667, %v798_v43  ;;  %v544_v55 = vmax.f32 %v288_v45, 0.0  ;;  %v545_v56 = vmax.f32 %v289_v46, 0.0  ;;  %v546_v57 = vmax.f32 %v290_v47, 0.0  ;;  %v39_v60 = vld [vmem:[#allocation2 + $0x80] sm:$0xff] }
  0x20   :  { %v547_v58 = vmax.f32 %v291_v48, 0.0  ;;  %v548_v59 = vmax.f32 %v292_v49, 0.0  ;;  %1310 = vst [vmem:[#allocation5 + $0x30] sm:$0xff] %v1054_v52  ;;  %v799_v61 = vmin.f32 %v543_v54, 6.0  ;;  %v293_v63 = vadd.f32 3.0, %v37_v50  ;;  %v40_v1 = vld [vmem:[#allocation2 + $0x88] sm:$0xff] }
  0x21   :  { %1311 = vst [vmem:[#allocation5 + $0x38] sm:$0xff] %v1055_v53  ;;  %v800_v62 = vmin.f32 %v544_v55, 6.0  ;;  %v294_v0 = vadd.f32 3.0, %v38_v51  ;;  %v41_v2 = vld [vmem:[#allocation2 + $0x90] sm:$0xff]  ;;  %v42_v3 = vld [vmem:[#allocation2 + $0x98] sm:$0xff]  ;;  %v801_v4 = vmin.f32 %v545_v56, 6.0 }
  0x22   :  { %v802_v5 = vmin.f32 %v546_v57, 6.0  ;;  %v803_v6 = vmin.f32 %v547_v58, 6.0  ;;  %v804_v7 = vmin.f32 %v548_v59, 6.0  ;;  %v43_v8 = vld [vmem:[#allocation2 + $0xa0] sm:$0xff]  ;;  %v44_v9 = vld [vmem:[#allocation2 + $0xa8] sm:$0xff]  ;;  %v549_v12 = vmax.f32 %v293_v63, 0.0 }
  0x23   :  { %v1056_v10 = vmul.f32 0.16666667, %v799_v61  ;;  %v1057_v11 = vmul.f32 0.16666667, %v800_v62  ;;  %v550_v13 = vmax.f32 %v294_v0, 0.0  ;;  %v295_v20 = vadd.f32 3.0, %v39_v60 }
  0x24   :  { %v1058_v14 = vmul.f32 0.16666667, %v801_v4  ;;  %v1059_v15 = vmul.f32 0.16666667, %v802_v5  ;;  %v1060_v16 = vmul.f32 0.16666667, %v803_v6 }
  0x25   :  { %1312 = vst [vmem:[#allocation5 + $0x40] sm:$0xff] %v1056_v10  ;;  %1313 = vst [vmem:[#allocation5 + $0x48] sm:$0xff] %v1057_v11  ;;  %v1061_v17 = vmul.f32 0.16666667, %v804_v7  ;;  %v805_v18 = vmin.f32 %v549_v12, 6.0  ;;  %v806_v19 = vmin.f32 %v550_v13, 6.0 }
  0x26   :  { %1314 = vst [vmem:[#allocation5 + $0x50] sm:$0xff] %v1058_v14  ;;  %1315 = vst [vmem:[#allocation5 + $0x58] sm:$0xff] %v1059_v15  ;;  %v296_v21 = vadd.f32 3.0, %v40_v1  ;;  %v297_v22 = vadd.f32 3.0, %v41_v2  ;;  %v298_v23 = vadd.f32 3.0, %v42_v3  ;;  %v299_v24 = vadd.f32 3.0, %v43_v8 }
  0x27   :  { %1316 = vst [vmem:[#allocation5 + $0x60] sm:$0xff] %v1060_v16  ;;  %v45_v25 = vld [vmem:[#allocation2 + $0xb0] sm:$0xff]  ;;  %v46_v26 = vld [vmem:[#allocation2 + $0xb8] sm:$0xff]  ;;  %1317 = vst [vmem:[#allocation5 + $0x68] sm:$0xff] %v1061_v17  ;;  %v1062_v27 = vmul.f32 0.16666667, %v805_v18 }
  0x28   :  { %v1063_v28 = vmul.f32 0.16666667, %v806_v19  ;;  %v551_v29 = vmax.f32 %v295_v20, 0.0  ;;  %v300_v30 = vadd.f32 3.0, %v44_v9  ;;  %v552_v31 = vmax.f32 %v296_v21, 0.0  ;;  %v47_v39 = vld [vmem:[#allocation2 + $0xc0] sm:$0xff] }
  0x29   :  { %v553_v32 = vmax.f32 %v297_v22, 0.0  ;;  %v554_v33 = vmax.f32 %v298_v23, 0.0  ;;  %v555_v34 = vmax.f32 %v299_v24, 0.0  ;;  %1318 = vst [vmem:[#allocation5 + $0x70] sm:$0xff] %v1062_v27  ;;  %v301_v37 = vadd.f32 3.0, %v45_v25  ;;  %v48_v40 = vld [vmem:[#allocation2 + $0xc8] sm:$0xff] }
  0x2a   :  { %1319 = vst [vmem:[#allocation5 + $0x78] sm:$0xff] %v1063_v28  ;;  %v807_v35 = vmin.f32 %v551_v29, 6.0  ;;  %v556_v36 = vmax.f32 %v300_v30, 0.0  ;;  %v302_v38 = vadd.f32 3.0, %v46_v26  ;;  %v49_v41 = vld [vmem:[#allocation2 + $0xd0] sm:$0xff]  ;;  %v808_v42 = vmin.f32 %v552_v31, 6.0 }
  0x2b   :  { %v809_v43 = vmin.f32 %v553_v32, 6.0  ;;  %v810_v44 = vmin.f32 %v554_v33, 6.0  ;;  %v811_v45 = vmin.f32 %v555_v34, 6.0  ;;  %v50_v46 = vld [vmem:[#allocation2 + $0xd8] sm:$0xff]  ;;  %v51_v47 = vld [vmem:[#allocation2 + $0xe0] sm:$0xff]  ;;  %v557_v50 = vmax.f32 %v301_v37, 0.0 }
  0x2c   :  { %v1064_v48 = vmul.f32 0.16666667, %v807_v35  ;;  %v812_v49 = vmin.f32 %v556_v36, 6.0  ;;  %v558_v51 = vmax.f32 %v302_v38, 0.0  ;;  %v52_v52 = vld [vmem:[#allocation2 + $0xe8] sm:$0xff]  ;;  %v303_v60 = vadd.f32 3.0, %v47_v39 }
  0x2d   :  { %v1065_v53 = vmul.f32 0.16666667, %v808_v42  ;;  %v1066_v54 = vmul.f32 0.16666667, %v809_v43  ;;  %v1067_v55 = vmul.f32 0.16666667, %v810_v44 }
  0x2e   :  { %1320 = vst [vmem:[#allocation5 + $0x80] sm:$0xff] %v1064_v48  ;;  %v1068_v56 = vmul.f32 0.16666667, %v811_v45  ;;  %v1069_v57 = vmul.f32 0.16666667, %v812_v49  ;;  %v813_v58 = vmin.f32 %v557_v50, 6.0 }
  0x2f   :  { %v814_v59 = vmin.f32 %v558_v51, 6.0  ;;  %1321 = vst [vmem:[#allocation5 + $0x88] sm:$0xff] %v1065_v53  ;;  %1322 = vst [vmem:[#allocation5 + $0x90] sm:$0xff] %v1066_v54  ;;  %v304_v61 = vadd.f32 3.0, %v48_v40  ;;  %v305_v62 = vadd.f32 3.0, %v49_v41  ;;  %v306_v63 = vadd.f32 3.0, %v50_v46 }
  0x30   :  { %1323 = vst [vmem:[#allocation5 + $0x98] sm:$0xff] %v1067_v55  ;;  %v53_v0 = vld [vmem:[#allocation2 + $0xf0] sm:$0xff]  ;;  %v54_v1 = vld [vmem:[#allocation2 + $0xf8] sm:$0xff]  ;;  %1324 = vst [vmem:[#allocation5 + $0xa0] sm:$0xff] %v1068_v56  ;;  %v1070_v2 = vmul.f32 0.16666667, %v813_v58 }
  0x31   :  { %1325 = vst [vmem:[#allocation5 + $0xa8] sm:$0xff] %v1069_v57  ;;  %v1071_v3 = vmul.f32 0.16666667, %v814_v59  ;;  %v307_v4 = vadd.f32 3.0, %v51_v47  ;;  %v308_v5 = vadd.f32 3.0, %v52_v52  ;;  %v559_v6 = vmax.f32 %v303_v60, 0.0 }
  0x32   :  { %v560_v7 = vmax.f32 %v304_v61, 0.0  ;;  %v561_v8 = vmax.f32 %v305_v62, 0.0  ;;  %v562_v9 = vmax.f32 %v306_v63, 0.0  ;;  %1326 = vst [vmem:[#allocation5 + $0xb0] sm:$0xff] %v1070_v2  ;;  %v309_v12 = vadd.f32 3.0, %v53_v0  ;;  %v55_v14 = vld [vmem:[#allocation2 + $0x100] sm:$0xff] }
  0x33   :  { %1327 = vst [vmem:[#allocation5 + $0xb8] sm:$0xff] %v1071_v3  ;;  %v563_v10 = vmax.f32 %v307_v4, 0.0  ;;  %v564_v11 = vmax.f32 %v308_v5, 0.0  ;;  %v310_v13 = vadd.f32 3.0, %v54_v1  ;;  %v56_v15 = vld [vmem:[#allocation2 + $0x108] sm:$0xff]  ;;  %v815_v16 = vmin.f32 %v559_v6, 6.0 }
  0x34   :  { %v816_v17 = vmin.f32 %v560_v7, 6.0  ;;  %v817_v18 = vmin.f32 %v561_v8, 6.0  ;;  %v818_v19 = vmin.f32 %v562_v9, 6.0  ;;  %v57_v20 = vld [vmem:[#allocation2 + $0x110] sm:$0xff]  ;;  %v58_v21 = vld [vmem:[#allocation2 + $0x118] sm:$0xff]  ;;  %v565_v24 = vmax.f32 %v309_v12, 0.0 }
  0x35   :  { %v819_v22 = vmin.f32 %v563_v10, 6.0  ;;  %v820_v23 = vmin.f32 %v564_v11, 6.0  ;;  %v566_v25 = vmax.f32 %v310_v13, 0.0  ;;  %v59_v26 = vld [vmem:[#allocation2 + $0x120] sm:$0xff]  ;;  %v60_v27 = vld [vmem:[#allocation2 + $0x128] sm:$0xff]  ;;  %v311_v36 = vadd.f32 3.0, %v55_v14 }
  0x36   :  { %v1072_v28 = vmul.f32 0.16666667, %v815_v16  ;;  %v1073_v29 = vmul.f32 0.16666667, %v816_v17  ;;  %v1074_v30 = vmul.f32 0.16666667, %v817_v18 }
  0x37   :  { %v1075_v31 = vmul.f32 0.16666667, %v818_v19  ;;  %v1076_v32 = vmul.f32 0.16666667, %v819_v22  ;;  %v1077_v33 = vmul.f32 0.16666667, %v820_v23 }
  0x38   :  { %1328 = vst [vmem:[#allocation5 + $0xc0] sm:$0xff] %v1072_v28  ;;  %1329 = vst [vmem:[#allocation5 + $0xc8] sm:$0xff] %v1073_v29  ;;  %v821_v34 = vmin.f32 %v565_v24, 6.0  ;;  %v822_v35 = vmin.f32 %v566_v25, 6.0  ;;  %v312_v37 = vadd.f32 3.0, %v56_v15  ;;  %v313_v38 = vadd.f32 3.0, %v57_v20 }
  0x39   :  { %1330 = vst [vmem:[#allocation5 + $0xd0] sm:$0xff] %v1074_v30  ;;  %1331 = vst [vmem:[#allocation5 + $0xd8] sm:$0xff] %v1075_v31  ;;  %v314_v39 = vadd.f32 3.0, %v58_v21  ;;  %v315_v40 = vadd.f32 3.0, %v59_v26  ;;  %v316_v41 = vadd.f32 3.0, %v60_v27  ;;  %v61_v42 = vld [vmem:[#allocation2 + $0x130] sm:$0xff] }
  0x3a   :  { %1332 = vst [vmem:[#allocation5 + $0xe0] sm:$0xff] %v1076_v32  ;;  %1333 = vst [vmem:[#allocation5 + $0xe8] sm:$0xff] %v1077_v33  ;;  %v62_v43 = vld [vmem:[#allocation2 + $0x138] sm:$0xff]  ;;  %v1078_v44 = vmul.f32 0.16666667, %v821_v34  ;;  %v567_v46 = vmax.f32 %v311_v36, 0.0 }
  0x3b   :  { %v1079_v45 = vmul.f32 0.16666667, %v822_v35  ;;  %v568_v47 = vmax.f32 %v312_v37, 0.0  ;;  %v569_v48 = vmax.f32 %v313_v38, 0.0  ;;  %v570_v49 = vmax.f32 %v314_v39, 0.0  ;;  %v63_v52 = vld [vmem:[#allocation2 + $0x140] sm:$0xff] }
  0x3c   :  { %v571_v50 = vmax.f32 %v315_v40, 0.0  ;;  %v572_v51 = vmax.f32 %v316_v41, 0.0  ;;  %1334 = vst [vmem:[#allocation5 + $0xf0] sm:$0xff] %v1078_v44  ;;  %v823_v53 = vmin.f32 %v567_v46, 6.0  ;;  %v317_v55 = vadd.f32 3.0, %v61_v42  ;;  %v64_v57 = vld [vmem:[#allocation2 + $0x148] sm:$0xff] }
  0x3d   :  { %1335 = vst [vmem:[#allocation5 + $0xf8] sm:$0xff] %v1079_v45  ;;  %v824_v54 = vmin.f32 %v568_v47, 6.0  ;;  %v318_v56 = vadd.f32 3.0, %v62_v43  ;;  %v65_v58 = vld [vmem:[#allocation2 + $0x150] sm:$0xff]  ;;  %v66_v59 = vld [vmem:[#allocation2 + $0x158] sm:$0xff]  ;;  %v825_v60 = vmin.f32 %v569_v48, 6.0 }
  0x3e   :  { %v826_v61 = vmin.f32 %v570_v49, 6.0  ;;  %v827_v62 = vmin.f32 %v571_v50, 6.0  ;;  %v828_v63 = vmin.f32 %v572_v51, 6.0  ;;  %v67_v0 = vld [vmem:[#allocation2 + $0x160] sm:$0xff]  ;;  %v68_v1 = vld [vmem:[#allocation2 + $0x168] sm:$0xff]  ;;  %v573_v4 = vmax.f32 %v317_v55, 0.0 }
  0x3f   :  { %v1080_v2 = vmul.f32 0.16666667, %v823_v53  ;;  %v1081_v3 = vmul.f32 0.16666667, %v824_v54  ;;  %v574_v5 = vmax.f32 %v318_v56, 0.0  ;;  %v319_v12 = vadd.f32 3.0, %v63_v52 }
  0x40   :  { %v1082_v6 = vmul.f32 0.16666667, %v825_v60  ;;  %v1083_v7 = vmul.f32 0.16666667, %v826_v61  ;;  %v1084_v8 = vmul.f32 0.16666667, %v827_v62 }
  0x41   :  { %1336 = vst [vmem:[#allocation5 + $0x100] sm:$0xff] %v1080_v2  ;;  %1337 = vst [vmem:[#allocation5 + $0x108] sm:$0xff] %v1081_v3  ;;  %v1085_v9 = vmul.f32 0.16666667, %v828_v63  ;;  %v829_v10 = vmin.f32 %v573_v4, 6.0  ;;  %v830_v11 = vmin.f32 %v574_v5, 6.0 }
  0x42   :  { %1338 = vst [vmem:[#allocation5 + $0x110] sm:$0xff] %v1082_v6  ;;  %1339 = vst [vmem:[#allocation5 + $0x118] sm:$0xff] %v1083_v7  ;;  %v320_v13 = vadd.f32 3.0, %v64_v57  ;;  %v321_v14 = vadd.f32 3.0, %v65_v58  ;;  %v322_v15 = vadd.f32 3.0, %v66_v59  ;;  %v323_v16 = vadd.f32 3.0, %v67_v0 }
  0x43   :  { %1340 = vst [vmem:[#allocation5 + $0x120] sm:$0xff] %v1084_v8  ;;  %v69_v17 = vld [vmem:[#allocation2 + $0x170] sm:$0xff]  ;;  %v70_v18 = vld [vmem:[#allocation2 + $0x178] sm:$0xff]  ;;  %1341 = vst [vmem:[#allocation5 + $0x128] sm:$0xff] %v1085_v9  ;;  %v1086_v19 = vmul.f32 0.16666667, %v829_v10 }
  0x44   :  { %v1087_v20 = vmul.f32 0.16666667, %v830_v11  ;;  %v575_v21 = vmax.f32 %v319_v12, 0.0  ;;  %v324_v22 = vadd.f32 3.0, %v68_v1  ;;  %v576_v23 = vmax.f32 %v320_v13, 0.0  ;;  %v71_v31 = vld [vmem:[#allocation2 + $0x180] sm:$0xff] }
  0x45   :  { %v577_v24 = vmax.f32 %v321_v14, 0.0  ;;  %v578_v25 = vmax.f32 %v322_v15, 0.0  ;;  %v579_v26 = vmax.f32 %v323_v16, 0.0  ;;  %1342 = vst [vmem:[#allocation5 + $0x130] sm:$0xff] %v1086_v19  ;;  %v325_v29 = vadd.f32 3.0, %v69_v17  ;;  %v72_v32 = vld [vmem:[#allocation2 + $0x188] sm:$0xff] }
  0x46   :  { %1343 = vst [vmem:[#allocation5 + $0x138] sm:$0xff] %v1087_v20  ;;  %v831_v27 = vmin.f32 %v575_v21, 6.0  ;;  %v580_v28 = vmax.f32 %v324_v22, 0.0  ;;  %v326_v30 = vadd.f32 3.0, %v70_v18  ;;  %v73_v33 = vld [vmem:[#allocation2 + $0x190] sm:$0xff]  ;;  %v832_v34 = vmin.f32 %v576_v23, 6.0 }
  0x47   :  { %v833_v35 = vmin.f32 %v577_v24, 6.0  ;;  %v834_v36 = vmin.f32 %v578_v25, 6.0  ;;  %v835_v37 = vmin.f32 %v579_v26, 6.0  ;;  %v74_v38 = vld [vmem:[#allocation2 + $0x198] sm:$0xff]  ;;  %v75_v39 = vld [vmem:[#allocation2 + $0x1a0] sm:$0xff]  ;;  %v581_v42 = vmax.f32 %v325_v29, 0.0 }
  0x48   :  { %v1088_v40 = vmul.f32 0.16666667, %v831_v27  ;;  %v836_v41 = vmin.f32 %v580_v28, 6.0  ;;  %v582_v43 = vmax.f32 %v326_v30, 0.0  ;;  %v76_v44 = vld [vmem:[#allocation2 + $0x1a8] sm:$0xff]  ;;  %v327_v52 = vadd.f32 3.0, %v71_v31 }
  0x49   :  { %v1089_v45 = vmul.f32 0.16666667, %v832_v34  ;;  %v1090_v46 = vmul.f32 0.16666667, %v833_v35  ;;  %v1091_v47 = vmul.f32 0.16666667, %v834_v36 }
  0x4a   :  { %1344 = vst [vmem:[#allocation5 + $0x140] sm:$0xff] %v1088_v40  ;;  %v1092_v48 = vmul.f32 0.16666667, %v835_v37  ;;  %v1093_v49 = vmul.f32 0.16666667, %v836_v41  ;;  %v837_v50 = vmin.f32 %v581_v42, 6.0 }
  0x4b   :  { %v838_v51 = vmin.f32 %v582_v43, 6.0  ;;  %1345 = vst [vmem:[#allocation5 + $0x148] sm:$0xff] %v1089_v45  ;;  %1346 = vst [vmem:[#allocation5 + $0x150] sm:$0xff] %v1090_v46  ;;  %v328_v53 = vadd.f32 3.0, %v72_v32  ;;  %v329_v54 = vadd.f32 3.0, %v73_v33  ;;  %v330_v55 = vadd.f32 3.0, %v74_v38 }
  0x4c   :  { %1347 = vst [vmem:[#allocation5 + $0x158] sm:$0xff] %v1091_v47  ;;  %v77_v56 = vld [vmem:[#allocation2 + $0x1b0] sm:$0xff]  ;;  %v78_v57 = vld [vmem:[#allocation2 + $0x1b8] sm:$0xff]  ;;  %1348 = vst [vmem:[#allocation5 + $0x160] sm:$0xff] %v1092_v48  ;;  %v1094_v58 = vmul.f32 0.16666667, %v837_v50 }
  0x4d   :  { %1349 = vst [vmem:[#allocation5 + $0x168] sm:$0xff] %v1093_v49  ;;  %v1095_v59 = vmul.f32 0.16666667, %v838_v51  ;;  %v331_v60 = vadd.f32 3.0, %v75_v39  ;;  %v332_v61 = vadd.f32 3.0, %v76_v44  ;;  %v583_v62 = vmax.f32 %v327_v52, 0.0 }
  0x4e   :  { %v584_v63 = vmax.f32 %v328_v53, 0.0  ;;  %v585_v0 = vmax.f32 %v329_v54, 0.0  ;;  %v586_v1 = vmax.f32 %v330_v55, 0.0  ;;  %1350 = vst [vmem:[#allocation5 + $0x170] sm:$0xff] %v1094_v58  ;;  %v333_v4 = vadd.f32 3.0, %v77_v56  ;;  %v79_v6 = vld [vmem:[#allocation2 + $0x1c0] sm:$0xff] }
  0x4f   :  { %1351 = vst [vmem:[#allocation5 + $0x178] sm:$0xff] %v1095_v59  ;;  %v587_v2 = vmax.f32 %v331_v60, 0.0  ;;  %v588_v3 = vmax.f32 %v332_v61, 0.0  ;;  %v334_v5 = vadd.f32 3.0, %v78_v57  ;;  %v80_v7 = vld [vmem:[#allocation2 + $0x1c8] sm:$0xff]  ;;  %v839_v8 = vmin.f32 %v583_v62, 6.0 }
  0x50   :  { %v840_v9 = vmin.f32 %v584_v63, 6.0  ;;  %v841_v10 = vmin.f32 %v585_v0, 6.0  ;;  %v842_v11 = vmin.f32 %v586_v1, 6.0  ;;  %v81_v12 = vld [vmem:[#allocation2 + $0x1d0] sm:$0xff]  ;;  %v82_v13 = vld [vmem:[#allocation2 + $0x1d8] sm:$0xff]  ;;  %v589_v16 = vmax.f32 %v333_v4, 0.0 }
  0x51   :  { %v843_v14 = vmin.f32 %v587_v2, 6.0  ;;  %v844_v15 = vmin.f32 %v588_v3, 6.0  ;;  %v590_v17 = vmax.f32 %v334_v5, 0.0  ;;  %v83_v18 = vld [vmem:[#allocation2 + $0x1e0] sm:$0xff]  ;;  %v84_v19 = vld [vmem:[#allocation2 + $0x1e8] sm:$0xff]  ;;  %v335_v28 = vadd.f32 3.0, %v79_v6 }
  0x52   :  { %v1096_v20 = vmul.f32 0.16666667, %v839_v8  ;;  %v1097_v21 = vmul.f32 0.16666667, %v840_v9  ;;  %v1098_v22 = vmul.f32 0.16666667, %v841_v10 }
  0x53   :  { %v1099_v23 = vmul.f32 0.16666667, %v842_v11  ;;  %v1100_v24 = vmul.f32 0.16666667, %v843_v14  ;;  %v1101_v25 = vmul.f32 0.16666667, %v844_v15 }
  0x54   :  { %1352 = vst [vmem:[#allocation5 + $0x180] sm:$0xff] %v1096_v20  ;;  %1353 = vst [vmem:[#allocation5 + $0x188] sm:$0xff] %v1097_v21  ;;  %v845_v26 = vmin.f32 %v589_v16, 6.0  ;;  %v846_v27 = vmin.f32 %v590_v17, 6.0  ;;  %v336_v29 = vadd.f32 3.0, %v80_v7  ;;  %v337_v30 = vadd.f32 3.0, %v81_v12 }
  0x55   :  { %1354 = vst [vmem:[#allocation5 + $0x190] sm:$0xff] %v1098_v22  ;;  %1355 = vst [vmem:[#allocation5 + $0x198] sm:$0xff] %v1099_v23  ;;  %v338_v31 = vadd.f32 3.0, %v82_v13  ;;  %v339_v32 = vadd.f32 3.0, %v83_v18  ;;  %v340_v33 = vadd.f32 3.0, %v84_v19  ;;  %v85_v34 = vld [vmem:[#allocation2 + $0x1f0] sm:$0xff] }
  0x56   :  { %1356 = vst [vmem:[#allocation5 + $0x1a0] sm:$0xff] %v1100_v24  ;;  %1357 = vst [vmem:[#allocation5 + $0x1a8] sm:$0xff] %v1101_v25  ;;  %v86_v35 = vld [vmem:[#allocation2 + $0x1f8] sm:$0xff]  ;;  %v1102_v36 = vmul.f32 0.16666667, %v845_v26  ;;  %v591_v38 = vmax.f32 %v335_v28, 0.0 }
  0x57   :  { %v1103_v37 = vmul.f32 0.16666667, %v846_v27  ;;  %v592_v39 = vmax.f32 %v336_v29, 0.0  ;;  %v593_v40 = vmax.f32 %v337_v30, 0.0  ;;  %v594_v41 = vmax.f32 %v338_v31, 0.0  ;;  %v87_v44 = vld [vmem:[#allocation2 + $0x200] sm:$0xff] }
  0x58   :  { %v595_v42 = vmax.f32 %v339_v32, 0.0  ;;  %v596_v43 = vmax.f32 %v340_v33, 0.0  ;;  %1358 = vst [vmem:[#allocation5 + $0x1b0] sm:$0xff] %v1102_v36  ;;  %v847_v45 = vmin.f32 %v591_v38, 6.0  ;;  %v341_v47 = vadd.f32 3.0, %v85_v34  ;;  %v88_v49 = vld [vmem:[#allocation2 + $0x208] sm:$0xff] }
  0x59   :  { %1359 = vst [vmem:[#allocation5 + $0x1b8] sm:$0xff] %v1103_v37  ;;  %v848_v46 = vmin.f32 %v592_v39, 6.0  ;;  %v342_v48 = vadd.f32 3.0, %v86_v35  ;;  %v89_v50 = vld [vmem:[#allocation2 + $0x210] sm:$0xff]  ;;  %v90_v51 = vld [vmem:[#allocation2 + $0x218] sm:$0xff]  ;;  %v849_v52 = vmin.f32 %v593_v40, 6.0 }
  0x5a   :  { %v850_v53 = vmin.f32 %v594_v41, 6.0  ;;  %v851_v54 = vmin.f32 %v595_v42, 6.0  ;;  %v852_v55 = vmin.f32 %v596_v43, 6.0  ;;  %v91_v56 = vld [vmem:[#allocation2 + $0x220] sm:$0xff]  ;;  %v92_v57 = vld [vmem:[#allocation2 + $0x228] sm:$0xff]  ;;  %v597_v60 = vmax.f32 %v341_v47, 0.0 }
  0x5b   :  { %v1104_v58 = vmul.f32 0.16666667, %v847_v45  ;;  %v1105_v59 = vmul.f32 0.16666667, %v848_v46  ;;  %v598_v61 = vmax.f32 %v342_v48, 0.0  ;;  %v343_v4 = vadd.f32 3.0, %v87_v44 }
  0x5c   :  { %v1106_v62 = vmul.f32 0.16666667, %v849_v52  ;;  %v1107_v63 = vmul.f32 0.16666667, %v850_v53  ;;  %v1108_v0 = vmul.f32 0.16666667, %v851_v54 }
  0x5d   :  { %1360 = vst [vmem:[#allocation5 + $0x1c0] sm:$0xff] %v1104_v58  ;;  %1361 = vst [vmem:[#allocation5 + $0x1c8] sm:$0xff] %v1105_v59  ;;  %v1109_v1 = vmul.f32 0.16666667, %v852_v55  ;;  %v853_v2 = vmin.f32 %v597_v60, 6.0  ;;  %v854_v3 = vmin.f32 %v598_v61, 6.0 }
  0x5e   :  { %1362 = vst [vmem:[#allocation5 + $0x1d0] sm:$0xff] %v1106_v62  ;;  %1363 = vst [vmem:[#allocation5 + $0x1d8] sm:$0xff] %v1107_v63  ;;  %v344_v5 = vadd.f32 3.0, %v88_v49  ;;  %v345_v6 = vadd.f32 3.0, %v89_v50  ;;  %v346_v7 = vadd.f32 3.0, %v90_v51  ;;  %v347_v8 = vadd.f32 3.0, %v91_v56 }
  0x5f   :  { %1364 = vst [vmem:[#allocation5 + $0x1e0] sm:$0xff] %v1108_v0  ;;  %v93_v9 = vld [vmem:[#allocation2 + $0x230] sm:$0xff]  ;;  %v94_v10 = vld [vmem:[#allocation2 + $0x238] sm:$0xff]  ;;  %1365 = vst [vmem:[#allocation5 + $0x1e8] sm:$0xff] %v1109_v1  ;;  %v1110_v11 = vmul.f32 0.16666667, %v853_v2 }
  0x60   :  { %v1111_v12 = vmul.f32 0.16666667, %v854_v3  ;;  %v599_v13 = vmax.f32 %v343_v4, 0.0  ;;  %v348_v14 = vadd.f32 3.0, %v92_v57  ;;  %v600_v15 = vmax.f32 %v344_v5, 0.0  ;;  %v95_v23 = vld [vmem:[#allocation2 + $0x240] sm:$0xff] }
  0x61   :  { %v601_v16 = vmax.f32 %v345_v6, 0.0  ;;  %v602_v17 = vmax.f32 %v346_v7, 0.0  ;;  %v603_v18 = vmax.f32 %v347_v8, 0.0  ;;  %1366 = vst [vmem:[#allocation5 + $0x1f0] sm:$0xff] %v1110_v11  ;;  %v349_v21 = vadd.f32 3.0, %v93_v9  ;;  %v96_v24 = vld [vmem:[#allocation2 + $0x248] sm:$0xff] }
  0x62   :  { %1367 = vst [vmem:[#allocation5 + $0x1f8] sm:$0xff] %v1111_v12  ;;  %v855_v19 = vmin.f32 %v599_v13, 6.0  ;;  %v604_v20 = vmax.f32 %v348_v14, 0.0  ;;  %v350_v22 = vadd.f32 3.0, %v94_v10  ;;  %v97_v25 = vld [vmem:[#allocation2 + $0x250] sm:$0xff]  ;;  %v856_v26 = vmin.f32 %v600_v15, 6.0 }
  0x63   :  { %v857_v27 = vmin.f32 %v601_v16, 6.0  ;;  %v858_v28 = vmin.f32 %v602_v17, 6.0  ;;  %v859_v29 = vmin.f32 %v603_v18, 6.0  ;;  %v98_v30 = vld [vmem:[#allocation2 + $0x258] sm:$0xff]  ;;  %v99_v31 = vld [vmem:[#allocation2 + $0x260] sm:$0xff]  ;;  %v605_v34 = vmax.f32 %v349_v21, 0.0 }
  0x64   :  { %v1112_v32 = vmul.f32 0.16666667, %v855_v19  ;;  %v860_v33 = vmin.f32 %v604_v20, 6.0  ;;  %v606_v35 = vmax.f32 %v350_v22, 0.0  ;;  %v100_v36 = vld [vmem:[#allocation2 + $0x268] sm:$0xff]  ;;  %v351_v44 = vadd.f32 3.0, %v95_v23 }
  0x65   :  { %v1113_v37 = vmul.f32 0.16666667, %v856_v26  ;;  %v1114_v38 = vmul.f32 0.16666667, %v857_v27  ;;  %v1115_v39 = vmul.f32 0.16666667, %v858_v28 }
  0x66   :  { %1368 = vst [vmem:[#allocation5 + $0x200] sm:$0xff] %v1112_v32  ;;  %v1116_v40 = vmul.f32 0.16666667, %v859_v29  ;;  %v1117_v41 = vmul.f32 0.16666667, %v860_v33  ;;  %v861_v42 = vmin.f32 %v605_v34, 6.0 }
  0x67   :  { %v862_v43 = vmin.f32 %v606_v35, 6.0  ;;  %1369 = vst [vmem:[#allocation5 + $0x208] sm:$0xff] %v1113_v37  ;;  %1370 = vst [vmem:[#allocation5 + $0x210] sm:$0xff] %v1114_v38  ;;  %v352_v45 = vadd.f32 3.0, %v96_v24  ;;  %v353_v46 = vadd.f32 3.0, %v97_v25  ;;  %v354_v47 = vadd.f32 3.0, %v98_v30 }
  0x68   :  { %1371 = vst [vmem:[#allocation5 + $0x218] sm:$0xff] %v1115_v39  ;;  %v101_v48 = vld [vmem:[#allocation2 + $0x270] sm:$0xff]  ;;  %v102_v49 = vld [vmem:[#allocation2 + $0x278] sm:$0xff]  ;;  %1372 = vst [vmem:[#allocation5 + $0x220] sm:$0xff] %v1116_v40  ;;  %v1118_v50 = vmul.f32 0.16666667, %v861_v42 }
  0x69   :  { %1373 = vst [vmem:[#allocation5 + $0x228] sm:$0xff] %v1117_v41  ;;  %v1119_v51 = vmul.f32 0.16666667, %v862_v43  ;;  %v355_v52 = vadd.f32 3.0, %v99_v31  ;;  %v356_v53 = vadd.f32 3.0, %v100_v36  ;;  %v607_v54 = vmax.f32 %v351_v44, 0.0 }
  0x6a   :  { %v608_v55 = vmax.f32 %v352_v45, 0.0  ;;  %v609_v56 = vmax.f32 %v353_v46, 0.0  ;;  %v610_v57 = vmax.f32 %v354_v47, 0.0  ;;  %1374 = vst [vmem:[#allocation5 + $0x230] sm:$0xff] %v1118_v50  ;;  %v357_v60 = vadd.f32 3.0, %v101_v48  ;;  %v103_v62 = vld [vmem:[#allocation2 + $0x280] sm:$0xff] }
  0x6b   :  { %1375 = vst [vmem:[#allocation5 + $0x238] sm:$0xff] %v1119_v51  ;;  %v611_v58 = vmax.f32 %v355_v52, 0.0  ;;  %v612_v59 = vmax.f32 %v356_v53, 0.0  ;;  %v358_v61 = vadd.f32 3.0, %v102_v49  ;;  %v104_v63 = vld [vmem:[#allocation2 + $0x288] sm:$0xff]  ;;  %v863_v0 = vmin.f32 %v607_v54, 6.0 }
  0x6c   :  { %v864_v1 = vmin.f32 %v608_v55, 6.0  ;;  %v865_v2 = vmin.f32 %v609_v56, 6.0  ;;  %v866_v3 = vmin.f32 %v610_v57, 6.0  ;;  %v105_v4 = vld [vmem:[#allocation2 + $0x290] sm:$0xff]  ;;  %v106_v5 = vld [vmem:[#allocation2 + $0x298] sm:$0xff]  ;;  %v613_v8 = vmax.f32 %v357_v60, 0.0 }
  0x6d   :  { %v867_v6 = vmin.f32 %v611_v58, 6.0  ;;  %v868_v7 = vmin.f32 %v612_v59, 6.0  ;;  %v614_v9 = vmax.f32 %v358_v61, 0.0  ;;  %v107_v10 = vld [vmem:[#allocation2 + $0x2a0] sm:$0xff]  ;;  %v108_v11 = vld [vmem:[#allocation2 + $0x2a8] sm:$0xff]  ;;  %v359_v20 = vadd.f32 3.0, %v103_v62 }
  0x6e   :  { %v1120_v12 = vmul.f32 0.16666667, %v863_v0  ;;  %v1121_v13 = vmul.f32 0.16666667, %v864_v1  ;;  %v1122_v14 = vmul.f32 0.16666667, %v865_v2 }
  0x6f   :  { %v1123_v15 = vmul.f32 0.16666667, %v866_v3  ;;  %v1124_v16 = vmul.f32 0.16666667, %v867_v6  ;;  %v1125_v17 = vmul.f32 0.16666667, %v868_v7 }
  0x70   :  { %1376 = vst [vmem:[#allocation5 + $0x240] sm:$0xff] %v1120_v12  ;;  %1377 = vst [vmem:[#allocation5 + $0x248] sm:$0xff] %v1121_v13  ;;  %v869_v18 = vmin.f32 %v613_v8, 6.0  ;;  %v870_v19 = vmin.f32 %v614_v9, 6.0  ;;  %v360_v21 = vadd.f32 3.0, %v104_v63  ;;  %v361_v22 = vadd.f32 3.0, %v105_v4 }
  0x71   :  { %1378 = vst [vmem:[#allocation5 + $0x250] sm:$0xff] %v1122_v14  ;;  %1379 = vst [vmem:[#allocation5 + $0x258] sm:$0xff] %v1123_v15  ;;  %v362_v23 = vadd.f32 3.0, %v106_v5  ;;  %v363_v24 = vadd.f32 3.0, %v107_v10  ;;  %v364_v25 = vadd.f32 3.0, %v108_v11  ;;  %v109_v26 = vld [vmem:[#allocation2 + $0x2b0] sm:$0xff] }
  0x72   :  { %1380 = vst [vmem:[#allocation5 + $0x260] sm:$0xff] %v1124_v16  ;;  %1381 = vst [vmem:[#allocation5 + $0x268] sm:$0xff] %v1125_v17  ;;  %v110_v27 = vld [vmem:[#allocation2 + $0x2b8] sm:$0xff]  ;;  %v1126_v28 = vmul.f32 0.16666667, %v869_v18  ;;  %v615_v30 = vmax.f32 %v359_v20, 0.0 }
  0x73   :  { %v1127_v29 = vmul.f32 0.16666667, %v870_v19  ;;  %v616_v31 = vmax.f32 %v360_v21, 0.0  ;;  %v617_v32 = vmax.f32 %v361_v22, 0.0  ;;  %v618_v33 = vmax.f32 %v362_v23, 0.0  ;;  %v111_v36 = vld [vmem:[#allocation2 + $0x2c0] sm:$0xff] }
  0x74   :  { %v619_v34 = vmax.f32 %v363_v24, 0.0  ;;  %v620_v35 = vmax.f32 %v364_v25, 0.0  ;;  %1382 = vst [vmem:[#allocation5 + $0x270] sm:$0xff] %v1126_v28  ;;  %v871_v37 = vmin.f32 %v615_v30, 6.0  ;;  %v365_v39 = vadd.f32 3.0, %v109_v26  ;;  %v112_v41 = vld [vmem:[#allocation2 + $0x2c8] sm:$0xff] }
  0x75   :  { %1383 = vst [vmem:[#allocation5 + $0x278] sm:$0xff] %v1127_v29  ;;  %v872_v38 = vmin.f32 %v616_v31, 6.0  ;;  %v366_v40 = vadd.f32 3.0, %v110_v27  ;;  %v113_v42 = vld [vmem:[#allocation2 + $0x2d0] sm:$0xff]  ;;  %v114_v43 = vld [vmem:[#allocation2 + $0x2d8] sm:$0xff]  ;;  %v873_v44 = vmin.f32 %v617_v32, 6.0 }
  0x76   :  { %v874_v45 = vmin.f32 %v618_v33, 6.0  ;;  %v875_v46 = vmin.f32 %v619_v34, 6.0  ;;  %v876_v47 = vmin.f32 %v620_v35, 6.0  ;;  %v115_v48 = vld [vmem:[#allocation2 + $0x2e0] sm:$0xff]  ;;  %v116_v49 = vld [vmem:[#allocation2 + $0x2e8] sm:$0xff]  ;;  %v621_v52 = vmax.f32 %v365_v39, 0.0 }
  0x77   :  { %v1128_v50 = vmul.f32 0.16666667, %v871_v37  ;;  %v1129_v51 = vmul.f32 0.16666667, %v872_v38  ;;  %v622_v53 = vmax.f32 %v366_v40, 0.0  ;;  %v367_v60 = vadd.f32 3.0, %v111_v36 }
  0x78   :  { %v1130_v54 = vmul.f32 0.16666667, %v873_v44  ;;  %v1131_v55 = vmul.f32 0.16666667, %v874_v45  ;;  %v1132_v56 = vmul.f32 0.16666667, %v875_v46 }
  0x79   :  { %1384 = vst [vmem:[#allocation5 + $0x280] sm:$0xff] %v1128_v50  ;;  %1385 = vst [vmem:[#allocation5 + $0x288] sm:$0xff] %v1129_v51  ;;  %v1133_v57 = vmul.f32 0.16666667, %v876_v47  ;;  %v877_v58 = vmin.f32 %v621_v52, 6.0  ;;  %v878_v59 = vmin.f32 %v622_v53, 6.0 }
  0x7a   :  { %1386 = vst [vmem:[#allocation5 + $0x290] sm:$0xff] %v1130_v54  ;;  %1387 = vst [vmem:[#allocation5 + $0x298] sm:$0xff] %v1131_v55  ;;  %v368_v61 = vadd.f32 3.0, %v112_v41  ;;  %v369_v62 = vadd.f32 3.0, %v113_v42  ;;  %v370_v63 = vadd.f32 3.0, %v114_v43  ;;  %v371_v0 = vadd.f32 3.0, %v115_v48 }
  0x7b   :  { %1388 = vst [vmem:[#allocation5 + $0x2a0] sm:$0xff] %v1132_v56  ;;  %v117_v1 = vld [vmem:[#allocation2 + $0x2f0] sm:$0xff]  ;;  %v118_v2 = vld [vmem:[#allocation2 + $0x2f8] sm:$0xff]  ;;  %1389 = vst [vmem:[#allocation5 + $0x2a8] sm:$0xff] %v1133_v57  ;;  %v1134_v3 = vmul.f32 0.16666667, %v877_v58 }
  0x7c   :  { %v1135_v4 = vmul.f32 0.16666667, %v878_v59  ;;  %v623_v5 = vmax.f32 %v367_v60, 0.0  ;;  %v372_v6 = vadd.f32 3.0, %v116_v49  ;;  %v624_v7 = vmax.f32 %v368_v61, 0.0  ;;  %v119_v15 = vld [vmem:[#allocation2 + $0x300] sm:$0xff] }
  0x7d   :  { %v625_v8 = vmax.f32 %v369_v62, 0.0  ;;  %v626_v9 = vmax.f32 %v370_v63, 0.0  ;;  %v627_v10 = vmax.f32 %v371_v0, 0.0  ;;  %1390 = vst [vmem:[#allocation5 + $0x2b0] sm:$0xff] %v1134_v3  ;;  %v373_v13 = vadd.f32 3.0, %v117_v1  ;;  %v120_v16 = vld [vmem:[#allocation2 + $0x308] sm:$0xff] }
  0x7e   :  { %1391 = vst [vmem:[#allocation5 + $0x2b8] sm:$0xff] %v1135_v4  ;;  %v879_v11 = vmin.f32 %v623_v5, 6.0  ;;  %v628_v12 = vmax.f32 %v372_v6, 0.0  ;;  %v374_v14 = vadd.f32 3.0, %v118_v2  ;;  %v121_v17 = vld [vmem:[#allocation2 + $0x310] sm:$0xff]  ;;  %v880_v18 = vmin.f32 %v624_v7, 6.0 }
  0x7f   :  { %v881_v19 = vmin.f32 %v625_v8, 6.0  ;;  %v882_v20 = vmin.f32 %v626_v9, 6.0  ;;  %v883_v21 = vmin.f32 %v627_v10, 6.0  ;;  %v122_v22 = vld [vmem:[#allocation2 + $0x318] sm:$0xff]  ;;  %v123_v23 = vld [vmem:[#allocation2 + $0x320] sm:$0xff]  ;;  %v629_v26 = vmax.f32 %v373_v13, 0.0 }
  0x80   :  { %v1136_v24 = vmul.f32 0.16666667, %v879_v11  ;;  %v884_v25 = vmin.f32 %v628_v12, 6.0  ;;  %v630_v27 = vmax.f32 %v374_v14, 0.0  ;;  %v124_v28 = vld [vmem:[#allocation2 + $0x328] sm:$0xff]  ;;  %v375_v36 = vadd.f32 3.0, %v119_v15 }
  0x81   :  { %v1137_v29 = vmul.f32 0.16666667, %v880_v18  ;;  %v1138_v30 = vmul.f32 0.16666667, %v881_v19  ;;  %v1139_v31 = vmul.f32 0.16666667, %v882_v20 }
  0x82   :  { %1392 = vst [vmem:[#allocation5 + $0x2c0] sm:$0xff] %v1136_v24  ;;  %v1140_v32 = vmul.f32 0.16666667, %v883_v21  ;;  %v1141_v33 = vmul.f32 0.16666667, %v884_v25  ;;  %v885_v34 = vmin.f32 %v629_v26, 6.0 }
  0x83   :  { %v886_v35 = vmin.f32 %v630_v27, 6.0  ;;  %1393 = vst [vmem:[#allocation5 + $0x2c8] sm:$0xff] %v1137_v29  ;;  %1394 = vst [vmem:[#allocation5 + $0x2d0] sm:$0xff] %v1138_v30  ;;  %v376_v37 = vadd.f32 3.0, %v120_v16  ;;  %v377_v38 = vadd.f32 3.0, %v121_v17  ;;  %v378_v39 = vadd.f32 3.0, %v122_v22 }
  0x84   :  { %1395 = vst [vmem:[#allocation5 + $0x2d8] sm:$0xff] %v1139_v31  ;;  %v125_v40 = vld [vmem:[#allocation2 + $0x330] sm:$0xff]  ;;  %v126_v41 = vld [vmem:[#allocation2 + $0x338] sm:$0xff]  ;;  %1396 = vst [vmem:[#allocation5 + $0x2e0] sm:$0xff] %v1140_v32  ;;  %v1142_v42 = vmul.f32 0.16666667, %v885_v34 }
  0x85   :  { %1397 = vst [vmem:[#allocation5 + $0x2e8] sm:$0xff] %v1141_v33  ;;  %v1143_v43 = vmul.f32 0.16666667, %v886_v35  ;;  %v379_v44 = vadd.f32 3.0, %v123_v23  ;;  %v380_v45 = vadd.f32 3.0, %v124_v28  ;;  %v631_v46 = vmax.f32 %v375_v36, 0.0 }
  0x86   :  { %v632_v47 = vmax.f32 %v376_v37, 0.0  ;;  %v633_v48 = vmax.f32 %v377_v38, 0.0  ;;  %v634_v49 = vmax.f32 %v378_v39, 0.0  ;;  %1398 = vst [vmem:[#allocation5 + $0x2f0] sm:$0xff] %v1142_v42  ;;  %v381_v52 = vadd.f32 3.0, %v125_v40  ;;  %v127_v54 = vld [vmem:[#allocation2 + $0x340] sm:$0xff] }
  0x87   :  { %1399 = vst [vmem:[#allocation5 + $0x2f8] sm:$0xff] %v1143_v43  ;;  %v635_v50 = vmax.f32 %v379_v44, 0.0  ;;  %v636_v51 = vmax.f32 %v380_v45, 0.0  ;;  %v382_v53 = vadd.f32 3.0, %v126_v41  ;;  %v128_v55 = vld [vmem:[#allocation2 + $0x348] sm:$0xff]  ;;  %v887_v56 = vmin.f32 %v631_v46, 6.0 }
  0x88   :  { %v888_v57 = vmin.f32 %v632_v47, 6.0  ;;  %v889_v58 = vmin.f32 %v633_v48, 6.0  ;;  %v890_v59 = vmin.f32 %v634_v49, 6.0  ;;  %v129_v60 = vld [vmem:[#allocation2 + $0x350] sm:$0xff]  ;;  %v130_v61 = vld [vmem:[#allocation2 + $0x358] sm:$0xff]  ;;  %v637_v0 = vmax.f32 %v381_v52, 0.0 }
  0x89   :  { %v891_v62 = vmin.f32 %v635_v50, 6.0  ;;  %v892_v63 = vmin.f32 %v636_v51, 6.0  ;;  %v638_v1 = vmax.f32 %v382_v53, 0.0  ;;  %v131_v2 = vld [vmem:[#allocation2 + $0x360] sm:$0xff]  ;;  %v132_v3 = vld [vmem:[#allocation2 + $0x368] sm:$0xff]  ;;  %v383_v12 = vadd.f32 3.0, %v127_v54 }
  0x8a   :  { %v1144_v4 = vmul.f32 0.16666667, %v887_v56  ;;  %v1145_v5 = vmul.f32 0.16666667, %v888_v57  ;;  %v1146_v6 = vmul.f32 0.16666667, %v889_v58 }
  0x8b   :  { %v1147_v7 = vmul.f32 0.16666667, %v890_v59  ;;  %v1148_v8 = vmul.f32 0.16666667, %v891_v62  ;;  %v1149_v9 = vmul.f32 0.16666667, %v892_v63 }
  0x8c   :  { %1400 = vst [vmem:[#allocation5 + $0x300] sm:$0xff] %v1144_v4  ;;  %1401 = vst [vmem:[#allocation5 + $0x308] sm:$0xff] %v1145_v5  ;;  %v893_v10 = vmin.f32 %v637_v0, 6.0  ;;  %v894_v11 = vmin.f32 %v638_v1, 6.0  ;;  %v384_v13 = vadd.f32 3.0, %v128_v55  ;;  %v385_v14 = vadd.f32 3.0, %v129_v60 }
  0x8d   :  { %1402 = vst [vmem:[#allocation5 + $0x310] sm:$0xff] %v1146_v6  ;;  %1403 = vst [vmem:[#allocation5 + $0x318] sm:$0xff] %v1147_v7  ;;  %v386_v15 = vadd.f32 3.0, %v130_v61  ;;  %v387_v16 = vadd.f32 3.0, %v131_v2  ;;  %v388_v17 = vadd.f32 3.0, %v132_v3  ;;  %v133_v18 = vld [vmem:[#allocation2 + $0x370] sm:$0xff] }
  0x8e   :  { %1404 = vst [vmem:[#allocation5 + $0x320] sm:$0xff] %v1148_v8  ;;  %1405 = vst [vmem:[#allocation5 + $0x328] sm:$0xff] %v1149_v9  ;;  %v134_v19 = vld [vmem:[#allocation2 + $0x378] sm:$0xff]  ;;  %v1150_v20 = vmul.f32 0.16666667, %v893_v10  ;;  %v639_v22 = vmax.f32 %v383_v12, 0.0 }
  0x8f   :  { %v1151_v21 = vmul.f32 0.16666667, %v894_v11  ;;  %v640_v23 = vmax.f32 %v384_v13, 0.0  ;;  %v641_v24 = vmax.f32 %v385_v14, 0.0  ;;  %v642_v25 = vmax.f32 %v386_v15, 0.0  ;;  %v135_v28 = vld [vmem:[#allocation2 + $0x380] sm:$0xff] }
  0x90   :  { %v643_v26 = vmax.f32 %v387_v16, 0.0  ;;  %v644_v27 = vmax.f32 %v388_v17, 0.0  ;;  %1406 = vst [vmem:[#allocation5 + $0x330] sm:$0xff] %v1150_v20  ;;  %v895_v29 = vmin.f32 %v639_v22, 6.0  ;;  %v389_v31 = vadd.f32 3.0, %v133_v18  ;;  %v136_v33 = vld [vmem:[#allocation2 + $0x388] sm:$0xff] }
  0x91   :  { %1407 = vst [vmem:[#allocation5 + $0x338] sm:$0xff] %v1151_v21  ;;  %v896_v30 = vmin.f32 %v640_v23, 6.0  ;;  %v390_v32 = vadd.f32 3.0, %v134_v19  ;;  %v137_v34 = vld [vmem:[#allocation2 + $0x390] sm:$0xff]  ;;  %v138_v35 = vld [vmem:[#allocation2 + $0x398] sm:$0xff]  ;;  %v897_v36 = vmin.f32 %v641_v24, 6.0 }
  0x92   :  { %v898_v37 = vmin.f32 %v642_v25, 6.0  ;;  %v899_v38 = vmin.f32 %v643_v26, 6.0  ;;  %v900_v39 = vmin.f32 %v644_v27, 6.0  ;;  %v139_v40 = vld [vmem:[#allocation2 + $0x3a0] sm:$0xff]  ;;  %v140_v41 = vld [vmem:[#allocation2 + $0x3a8] sm:$0xff]  ;;  %v645_v44 = vmax.f32 %v389_v31, 0.0 }
  0x93   :  { %v1152_v42 = vmul.f32 0.16666667, %v895_v29  ;;  %v1153_v43 = vmul.f32 0.16666667, %v896_v30  ;;  %v646_v45 = vmax.f32 %v390_v32, 0.0  ;;  %v391_v52 = vadd.f32 3.0, %v135_v28 }
  0x94   :  { %v1154_v46 = vmul.f32 0.16666667, %v897_v36  ;;  %v1155_v47 = vmul.f32 0.16666667, %v898_v37  ;;  %v1156_v48 = vmul.f32 0.16666667, %v899_v38 }
  0x95   :  { %1408 = vst [vmem:[#allocation5 + $0x340] sm:$0xff] %v1152_v42  ;;  %1409 = vst [vmem:[#allocation5 + $0x348] sm:$0xff] %v1153_v43  ;;  %v1157_v49 = vmul.f32 0.16666667, %v900_v39  ;;  %v901_v50 = vmin.f32 %v645_v44, 6.0  ;;  %v902_v51 = vmin.f32 %v646_v45, 6.0 }
  0x96   :  { %1410 = vst [vmem:[#allocation5 + $0x350] sm:$0xff] %v1154_v46  ;;  %1411 = vst [vmem:[#allocation5 + $0x358] sm:$0xff] %v1155_v47  ;;  %v392_v53 = vadd.f32 3.0, %v136_v33  ;;  %v393_v54 = vadd.f32 3.0, %v137_v34  ;;  %v394_v55 = vadd.f32 3.0, %v138_v35  ;;  %v395_v56 = vadd.f32 3.0, %v139_v40 }
  0x97   :  { %1412 = vst [vmem:[#allocation5 + $0x360] sm:$0xff] %v1156_v48  ;;  %v141_v57 = vld [vmem:[#allocation2 + $0x3b0] sm:$0xff]  ;;  %v142_v58 = vld [vmem:[#allocation2 + $0x3b8] sm:$0xff]  ;;  %1413 = vst [vmem:[#allocation5 + $0x368] sm:$0xff] %v1157_v49  ;;  %v1158_v59 = vmul.f32 0.16666667, %v901_v50 }
  0x98   :  { %v1159_v60 = vmul.f32 0.16666667, %v902_v51  ;;  %v647_v61 = vmax.f32 %v391_v52, 0.0  ;;  %v396_v62 = vadd.f32 3.0, %v140_v41  ;;  %v648_v63 = vmax.f32 %v392_v53, 0.0  ;;  %v143_v7 = vld [vmem:[#allocation2 + $0x3c0] sm:$0xff] }
  0x99   :  { %v649_v0 = vmax.f32 %v393_v54, 0.0  ;;  %v650_v1 = vmax.f32 %v394_v55, 0.0  ;;  %v651_v2 = vmax.f32 %v395_v56, 0.0  ;;  %1414 = vst [vmem:[#allocation5 + $0x370] sm:$0xff] %v1158_v59  ;;  %v397_v5 = vadd.f32 3.0, %v141_v57  ;;  %v144_v8 = vld [vmem:[#allocation2 + $0x3c8] sm:$0xff] }
  0x9a   :  { %1415 = vst [vmem:[#allocation5 + $0x378] sm:$0xff] %v1159_v60  ;;  %v903_v3 = vmin.f32 %v647_v61, 6.0  ;;  %v652_v4 = vmax.f32 %v396_v62, 0.0  ;;  %v398_v6 = vadd.f32 3.0, %v142_v58  ;;  %v145_v9 = vld [vmem:[#allocation2 + $0x3d0] sm:$0xff]  ;;  %v904_v10 = vmin.f32 %v648_v63, 6.0 }
  0x9b   :  { %v905_v11 = vmin.f32 %v649_v0, 6.0  ;;  %v906_v12 = vmin.f32 %v650_v1, 6.0  ;;  %v907_v13 = vmin.f32 %v651_v2, 6.0  ;;  %v146_v14 = vld [vmem:[#allocation2 + $0x3d8] sm:$0xff]  ;;  %v147_v15 = vld [vmem:[#allocation2 + $0x3e0] sm:$0xff]  ;;  %v653_v18 = vmax.f32 %v397_v5, 0.0 }
  0x9c   :  { %v1160_v16 = vmul.f32 0.16666667, %v903_v3  ;;  %v908_v17 = vmin.f32 %v652_v4, 6.0  ;;  %v654_v19 = vmax.f32 %v398_v6, 0.0  ;;  %v148_v20 = vld [vmem:[#allocation2 + $0x3e8] sm:$0xff]  ;;  %v399_v28 = vadd.f32 3.0, %v143_v7 }
  0x9d   :  { %v1161_v21 = vmul.f32 0.16666667, %v904_v10  ;;  %v1162_v22 = vmul.f32 0.16666667, %v905_v11  ;;  %v1163_v23 = vmul.f32 0.16666667, %v906_v12 }
  0x9e   :  { %1416 = vst [vmem:[#allocation5 + $0x380] sm:$0xff] %v1160_v16  ;;  %v1164_v24 = vmul.f32 0.16666667, %v907_v13  ;;  %v1165_v25 = vmul.f32 0.16666667, %v908_v17  ;;  %v909_v26 = vmin.f32 %v653_v18, 6.0 }
  0x9f   :  { %v910_v27 = vmin.f32 %v654_v19, 6.0  ;;  %1417 = vst [vmem:[#allocation5 + $0x388] sm:$0xff] %v1161_v21  ;;  %1418 = vst [vmem:[#allocation5 + $0x390] sm:$0xff] %v1162_v22  ;;  %v400_v29 = vadd.f32 3.0, %v144_v8  ;;  %v401_v30 = vadd.f32 3.0, %v145_v9  ;;  %v402_v31 = vadd.f32 3.0, %v146_v14 }
  0xa0   :  { %1419 = vst [vmem:[#allocation5 + $0x398] sm:$0xff] %v1163_v23  ;;  %v149_v32 = vld [vmem:[#allocation2 + $0x3f0] sm:$0xff]  ;;  %v150_v33 = vld [vmem:[#allocation2 + $0x3f8] sm:$0xff]  ;;  %1420 = vst [vmem:[#allocation5 + $0x3a0] sm:$0xff] %v1164_v24  ;;  %v1166_v34 = vmul.f32 0.16666667, %v909_v26 }
  0xa1   :  { %1421 = vst [vmem:[#allocation5 + $0x3a8] sm:$0xff] %v1165_v25  ;;  %v1167_v35 = vmul.f32 0.16666667, %v910_v27  ;;  %v403_v36 = vadd.f32 3.0, %v147_v15  ;;  %v404_v37 = vadd.f32 3.0, %v148_v20  ;;  %v655_v38 = vmax.f32 %v399_v28, 0.0 }
  0xa2   :  { %v656_v39 = vmax.f32 %v400_v29, 0.0  ;;  %v657_v40 = vmax.f32 %v401_v30, 0.0  ;;  %v658_v41 = vmax.f32 %v402_v31, 0.0  ;;  %1422 = vst [vmem:[#allocation5 + $0x3b0] sm:$0xff] %v1166_v34  ;;  %v405_v44 = vadd.f32 3.0, %v149_v32  ;;  %v151_v46 = vld [vmem:[#allocation2 + $0x400] sm:$0xff] }
  0xa3   :  { %1423 = vst [vmem:[#allocation5 + $0x3b8] sm:$0xff] %v1167_v35  ;;  %v659_v42 = vmax.f32 %v403_v36, 0.0  ;;  %v660_v43 = vmax.f32 %v404_v37, 0.0  ;;  %v406_v45 = vadd.f32 3.0, %v150_v33  ;;  %v152_v47 = vld [vmem:[#allocation2 + $0x408] sm:$0xff]  ;;  %v911_v48 = vmin.f32 %v655_v38, 6.0 }
  0xa4   :  { %v912_v49 = vmin.f32 %v656_v39, 6.0  ;;  %v913_v50 = vmin.f32 %v657_v40, 6.0  ;;  %v914_v51 = vmin.f32 %v658_v41, 6.0  ;;  %v153_v52 = vld [vmem:[#allocation2 + $0x410] sm:$0xff]  ;;  %v154_v53 = vld [vmem:[#allocation2 + $0x418] sm:$0xff]  ;;  %v661_v56 = vmax.f32 %v405_v44, 0.0 }
  0xa5   :  { %v915_v54 = vmin.f32 %v659_v42, 6.0  ;;  %v916_v55 = vmin.f32 %v660_v43, 6.0  ;;  %v662_v57 = vmax.f32 %v406_v45, 0.0  ;;  %v155_v58 = vld [vmem:[#allocation2 + $0x420] sm:$0xff]  ;;  %v156_v59 = vld [vmem:[#allocation2 + $0x428] sm:$0xff]  ;;  %v407_v4 = vadd.f32 3.0, %v151_v46 }
  0xa6   :  { %v1168_v60 = vmul.f32 0.16666667, %v911_v48  ;;  %v1169_v61 = vmul.f32 0.16666667, %v912_v49  ;;  %v1170_v62 = vmul.f32 0.16666667, %v913_v50 }
  0xa7   :  { %v1171_v63 = vmul.f32 0.16666667, %v914_v51  ;;  %v1172_v0 = vmul.f32 0.16666667, %v915_v54  ;;  %v1173_v1 = vmul.f32 0.16666667, %v916_v55 }
  0xa8   :  { %1424 = vst [vmem:[#allocation5 + $0x3c0] sm:$0xff] %v1168_v60  ;;  %1425 = vst [vmem:[#allocation5 + $0x3c8] sm:$0xff] %v1169_v61  ;;  %v917_v2 = vmin.f32 %v661_v56, 6.0  ;;  %v918_v3 = vmin.f32 %v662_v57, 6.0  ;;  %v408_v5 = vadd.f32 3.0, %v152_v47  ;;  %v409_v6 = vadd.f32 3.0, %v153_v52 }
  0xa9   :  { %1426 = vst [vmem:[#allocation5 + $0x3d0] sm:$0xff] %v1170_v62  ;;  %1427 = vst [vmem:[#allocation5 + $0x3d8] sm:$0xff] %v1171_v63  ;;  %v410_v7 = vadd.f32 3.0, %v154_v53  ;;  %v411_v8 = vadd.f32 3.0, %v155_v58  ;;  %v412_v9 = vadd.f32 3.0, %v156_v59  ;;  %v157_v10 = vld [vmem:[#allocation2 + $0x430] sm:$0xff] }
  0xaa   :  { %1428 = vst [vmem:[#allocation5 + $0x3e0] sm:$0xff] %v1172_v0  ;;  %1429 = vst [vmem:[#allocation5 + $0x3e8] sm:$0xff] %v1173_v1  ;;  %v158_v11 = vld [vmem:[#allocation2 + $0x438] sm:$0xff]  ;;  %v1174_v12 = vmul.f32 0.16666667, %v917_v2  ;;  %v663_v14 = vmax.f32 %v407_v4, 0.0 }
  0xab   :  { %v1175_v13 = vmul.f32 0.16666667, %v918_v3  ;;  %v664_v15 = vmax.f32 %v408_v5, 0.0  ;;  %v665_v16 = vmax.f32 %v409_v6, 0.0  ;;  %v666_v17 = vmax.f32 %v410_v7, 0.0  ;;  %v159_v20 = vld [vmem:[#allocation2 + $0x440] sm:$0xff] }
  0xac   :  { %v667_v18 = vmax.f32 %v411_v8, 0.0  ;;  %v668_v19 = vmax.f32 %v412_v9, 0.0  ;;  %1430 = vst [vmem:[#allocation5 + $0x3f0] sm:$0xff] %v1174_v12  ;;  %v919_v21 = vmin.f32 %v663_v14, 6.0  ;;  %v413_v23 = vadd.f32 3.0, %v157_v10  ;;  %v160_v25 = vld [vmem:[#allocation2 + $0x448] sm:$0xff] }
  0xad   :  { %1431 = vst [vmem:[#allocation5 + $0x3f8] sm:$0xff] %v1175_v13  ;;  %v920_v22 = vmin.f32 %v664_v15, 6.0  ;;  %v414_v24 = vadd.f32 3.0, %v158_v11  ;;  %v161_v26 = vld [vmem:[#allocation2 + $0x450] sm:$0xff]  ;;  %v162_v27 = vld [vmem:[#allocation2 + $0x458] sm:$0xff]  ;;  %v921_v28 = vmin.f32 %v665_v16, 6.0 }
  0xae   :  { %v922_v29 = vmin.f32 %v666_v17, 6.0  ;;  %v923_v30 = vmin.f32 %v667_v18, 6.0  ;;  %v924_v31 = vmin.f32 %v668_v19, 6.0  ;;  %v163_v32 = vld [vmem:[#allocation2 + $0x460] sm:$0xff]  ;;  %v164_v33 = vld [vmem:[#allocation2 + $0x468] sm:$0xff]  ;;  %v669_v36 = vmax.f32 %v413_v23, 0.0 }
  0xaf   :  { %v1176_v34 = vmul.f32 0.16666667, %v919_v21  ;;  %v1177_v35 = vmul.f32 0.16666667, %v920_v22  ;;  %v670_v37 = vmax.f32 %v414_v24, 0.0  ;;  %v415_v44 = vadd.f32 3.0, %v159_v20 }
  0xb0   :  { %v1178_v38 = vmul.f32 0.16666667, %v921_v28  ;;  %v1179_v39 = vmul.f32 0.16666667, %v922_v29  ;;  %v1180_v40 = vmul.f32 0.16666667, %v923_v30 }
  0xb1   :  { %1432 = vst [vmem:[#allocation5 + $0x400] sm:$0xff] %v1176_v34  ;;  %1433 = vst [vmem:[#allocation5 + $0x408] sm:$0xff] %v1177_v35  ;;  %v1181_v41 = vmul.f32 0.16666667, %v924_v31  ;;  %v925_v42 = vmin.f32 %v669_v36, 6.0  ;;  %v926_v43 = vmin.f32 %v670_v37, 6.0 }
  0xb2   :  { %1434 = vst [vmem:[#allocation5 + $0x410] sm:$0xff] %v1178_v38  ;;  %1435 = vst [vmem:[#allocation5 + $0x418] sm:$0xff] %v1179_v39  ;;  %v416_v45 = vadd.f32 3.0, %v160_v25  ;;  %v417_v46 = vadd.f32 3.0, %v161_v26  ;;  %v418_v47 = vadd.f32 3.0, %v162_v27  ;;  %v419_v48 = vadd.f32 3.0, %v163_v32 }
  0xb3   :  { %1436 = vst [vmem:[#allocation5 + $0x420] sm:$0xff] %v1180_v40  ;;  %v165_v49 = vld [vmem:[#allocation2 + $0x470] sm:$0xff]  ;;  %v166_v50 = vld [vmem:[#allocation2 + $0x478] sm:$0xff]  ;;  %1437 = vst [vmem:[#allocation5 + $0x428] sm:$0xff] %v1181_v41  ;;  %v1182_v51 = vmul.f32 0.16666667, %v925_v42 }
  0xb4   :  { %v1183_v52 = vmul.f32 0.16666667, %v926_v43  ;;  %v671_v53 = vmax.f32 %v415_v44, 0.0  ;;  %v420_v54 = vadd.f32 3.0, %v164_v33  ;;  %v672_v55 = vmax.f32 %v416_v45, 0.0  ;;  %v167_v63 = vld [vmem:[#allocation2 + $0x480] sm:$0xff] }
  0xb5   :  { %v673_v56 = vmax.f32 %v417_v46, 0.0  ;;  %v674_v57 = vmax.f32 %v418_v47, 0.0  ;;  %v675_v58 = vmax.f32 %v419_v48, 0.0  ;;  %1438 = vst [vmem:[#allocation5 + $0x430] sm:$0xff] %v1182_v51  ;;  %v421_v61 = vadd.f32 3.0, %v165_v49  ;;  %v168_v0 = vld [vmem:[#allocation2 + $0x488] sm:$0xff] }
  0xb6   :  { %1439 = vst [vmem:[#allocation5 + $0x438] sm:$0xff] %v1183_v52  ;;  %v927_v59 = vmin.f32 %v671_v53, 6.0  ;;  %v676_v60 = vmax.f32 %v420_v54, 0.0  ;;  %v422_v62 = vadd.f32 3.0, %v166_v50  ;;  %v169_v1 = vld [vmem:[#allocation2 + $0x490] sm:$0xff]  ;;  %v928_v2 = vmin.f32 %v672_v55, 6.0 }
  0xb7   :  { %v929_v3 = vmin.f32 %v673_v56, 6.0  ;;  %v930_v4 = vmin.f32 %v674_v57, 6.0  ;;  %v931_v5 = vmin.f32 %v675_v58, 6.0  ;;  %v170_v6 = vld [vmem:[#allocation2 + $0x498] sm:$0xff]  ;;  %v171_v7 = vld [vmem:[#allocation2 + $0x4a0] sm:$0xff]  ;;  %v677_v10 = vmax.f32 %v421_v61, 0.0 }
  0xb8   :  { %v1184_v8 = vmul.f32 0.16666667, %v927_v59  ;;  %v932_v9 = vmin.f32 %v676_v60, 6.0  ;;  %v678_v11 = vmax.f32 %v422_v62, 0.0  ;;  %v172_v12 = vld [vmem:[#allocation2 + $0x4a8] sm:$0xff]  ;;  %v423_v20 = vadd.f32 3.0, %v167_v63 }
  0xb9   :  { %v1185_v13 = vmul.f32 0.16666667, %v928_v2  ;;  %v1186_v14 = vmul.f32 0.16666667, %v929_v3  ;;  %v1187_v15 = vmul.f32 0.16666667, %v930_v4 }
  0xba   :  { %1440 = vst [vmem:[#allocation5 + $0x440] sm:$0xff] %v1184_v8  ;;  %v1188_v16 = vmul.f32 0.16666667, %v931_v5  ;;  %v1189_v17 = vmul.f32 0.16666667, %v932_v9  ;;  %v933_v18 = vmin.f32 %v677_v10, 6.0 }
  0xbb   :  { %v934_v19 = vmin.f32 %v678_v11, 6.0  ;;  %1441 = vst [vmem:[#allocation5 + $0x448] sm:$0xff] %v1185_v13  ;;  %1442 = vst [vmem:[#allocation5 + $0x450] sm:$0xff] %v1186_v14  ;;  %v424_v21 = vadd.f32 3.0, %v168_v0  ;;  %v425_v22 = vadd.f32 3.0, %v169_v1  ;;  %v426_v23 = vadd.f32 3.0, %v170_v6 }
  0xbc   :  { %1443 = vst [vmem:[#allocation5 + $0x458] sm:$0xff] %v1187_v15  ;;  %v173_v24 = vld [vmem:[#allocation2 + $0x4b0] sm:$0xff]  ;;  %v174_v25 = vld [vmem:[#allocation2 + $0x4b8] sm:$0xff]  ;;  %1444 = vst [vmem:[#allocation5 + $0x460] sm:$0xff] %v1188_v16  ;;  %v1190_v26 = vmul.f32 0.16666667, %v933_v18 }
  0xbd   :  { %1445 = vst [vmem:[#allocation5 + $0x468] sm:$0xff] %v1189_v17  ;;  %v1191_v27 = vmul.f32 0.16666667, %v934_v19  ;;  %v427_v28 = vadd.f32 3.0, %v171_v7  ;;  %v428_v29 = vadd.f32 3.0, %v172_v12  ;;  %v679_v30 = vmax.f32 %v423_v20, 0.0 }
  0xbe   :  { %v680_v31 = vmax.f32 %v424_v21, 0.0  ;;  %v681_v32 = vmax.f32 %v425_v22, 0.0  ;;  %v682_v33 = vmax.f32 %v426_v23, 0.0  ;;  %1446 = vst [vmem:[#allocation5 + $0x470] sm:$0xff] %v1190_v26  ;;  %v429_v36 = vadd.f32 3.0, %v173_v24  ;;  %v175_v38 = vld [vmem:[#allocation2 + $0x4c0] sm:$0xff] }
  0xbf   :  { %1447 = vst [vmem:[#allocation5 + $0x478] sm:$0xff] %v1191_v27  ;;  %v683_v34 = vmax.f32 %v427_v28, 0.0  ;;  %v684_v35 = vmax.f32 %v428_v29, 0.0  ;;  %v430_v37 = vadd.f32 3.0, %v174_v25  ;;  %v176_v39 = vld [vmem:[#allocation2 + $0x4c8] sm:$0xff]  ;;  %v935_v40 = vmin.f32 %v679_v30, 6.0 }
  0xc0   :  { %v936_v41 = vmin.f32 %v680_v31, 6.0  ;;  %v937_v42 = vmin.f32 %v681_v32, 6.0  ;;  %v938_v43 = vmin.f32 %v682_v33, 6.0  ;;  %v177_v44 = vld [vmem:[#allocation2 + $0x4d0] sm:$0xff]  ;;  %v178_v45 = vld [vmem:[#allocation2 + $0x4d8] sm:$0xff]  ;;  %v685_v48 = vmax.f32 %v429_v36, 0.0 }
  0xc1   :  { %v939_v46 = vmin.f32 %v683_v34, 6.0  ;;  %v940_v47 = vmin.f32 %v684_v35, 6.0  ;;  %v686_v49 = vmax.f32 %v430_v37, 0.0  ;;  %v179_v50 = vld [vmem:[#allocation2 + $0x4e0] sm:$0xff]  ;;  %v180_v51 = vld [vmem:[#allocation2 + $0x4e8] sm:$0xff]  ;;  %v431_v60 = vadd.f32 3.0, %v175_v38 }
  0xc2   :  { %v1192_v52 = vmul.f32 0.16666667, %v935_v40  ;;  %v1193_v53 = vmul.f32 0.16666667, %v936_v41  ;;  %v1194_v54 = vmul.f32 0.16666667, %v937_v42 }
  0xc3   :  { %v1195_v55 = vmul.f32 0.16666667, %v938_v43  ;;  %v1196_v56 = vmul.f32 0.16666667, %v939_v46  ;;  %v1197_v57 = vmul.f32 0.16666667, %v940_v47 }
  0xc4   :  { %1448 = vst [vmem:[#allocation5 + $0x480] sm:$0xff] %v1192_v52  ;;  %1449 = vst [vmem:[#allocation5 + $0x488] sm:$0xff] %v1193_v53  ;;  %v941_v58 = vmin.f32 %v685_v48, 6.0  ;;  %v942_v59 = vmin.f32 %v686_v49, 6.0  ;;  %v432_v61 = vadd.f32 3.0, %v176_v39  ;;  %v433_v62 = vadd.f32 3.0, %v177_v44 }
  0xc5   :  { %1450 = vst [vmem:[#allocation5 + $0x490] sm:$0xff] %v1194_v54  ;;  %1451 = vst [vmem:[#allocation5 + $0x498] sm:$0xff] %v1195_v55  ;;  %v434_v63 = vadd.f32 3.0, %v178_v45  ;;  %v435_v0 = vadd.f32 3.0, %v179_v50  ;;  %v436_v1 = vadd.f32 3.0, %v180_v51  ;;  %v181_v2 = vld [vmem:[#allocation2 + $0x4f0] sm:$0xff] }
  0xc6   :  { %1452 = vst [vmem:[#allocation5 + $0x4a0] sm:$0xff] %v1196_v56  ;;  %1453 = vst [vmem:[#allocation5 + $0x4a8] sm:$0xff] %v1197_v57  ;;  %v182_v3 = vld [vmem:[#allocation2 + $0x4f8] sm:$0xff]  ;;  %v1198_v4 = vmul.f32 0.16666667, %v941_v58  ;;  %v687_v6 = vmax.f32 %v431_v60, 0.0 }
  0xc7   :  { %v1199_v5 = vmul.f32 0.16666667, %v942_v59  ;;  %v688_v7 = vmax.f32 %v432_v61, 0.0  ;;  %v689_v8 = vmax.f32 %v433_v62, 0.0  ;;  %v690_v9 = vmax.f32 %v434_v63, 0.0  ;;  %v183_v12 = vld [vmem:[#allocation2 + $0x500] sm:$0xff] }
  0xc8   :  { %v691_v10 = vmax.f32 %v435_v0, 0.0  ;;  %v692_v11 = vmax.f32 %v436_v1, 0.0  ;;  %1454 = vst [vmem:[#allocation5 + $0x4b0] sm:$0xff] %v1198_v4  ;;  %v943_v13 = vmin.f32 %v687_v6, 6.0  ;;  %v437_v15 = vadd.f32 3.0, %v181_v2  ;;  %v184_v17 = vld [vmem:[#allocation2 + $0x508] sm:$0xff] }
  0xc9   :  { %1455 = vst [vmem:[#allocation5 + $0x4b8] sm:$0xff] %v1199_v5  ;;  %v944_v14 = vmin.f32 %v688_v7, 6.0  ;;  %v438_v16 = vadd.f32 3.0, %v182_v3  ;;  %v185_v18 = vld [vmem:[#allocation2 + $0x510] sm:$0xff]  ;;  %v186_v19 = vld [vmem:[#allocation2 + $0x518] sm:$0xff]  ;;  %v945_v20 = vmin.f32 %v689_v8, 6.0 }
  0xca   :  { %v946_v21 = vmin.f32 %v690_v9, 6.0  ;;  %v947_v22 = vmin.f32 %v691_v10, 6.0  ;;  %v948_v23 = vmin.f32 %v692_v11, 6.0  ;;  %v187_v24 = vld [vmem:[#allocation2 + $0x520] sm:$0xff]  ;;  %v188_v25 = vld [vmem:[#allocation2 + $0x528] sm:$0xff]  ;;  %v693_v28 = vmax.f32 %v437_v15, 0.0 }
  0xcb   :  { %v1200_v26 = vmul.f32 0.16666667, %v943_v13  ;;  %v1201_v27 = vmul.f32 0.16666667, %v944_v14  ;;  %v694_v29 = vmax.f32 %v438_v16, 0.0  ;;  %v439_v36 = vadd.f32 3.0, %v183_v12 }
  0xcc   :  { %v1202_v30 = vmul.f32 0.16666667, %v945_v20  ;;  %v1203_v31 = vmul.f32 0.16666667, %v946_v21  ;;  %v1204_v32 = vmul.f32 0.16666667, %v947_v22 }
  0xcd   :  { %1456 = vst [vmem:[#allocation5 + $0x4c0] sm:$0xff] %v1200_v26  ;;  %1457 = vst [vmem:[#allocation5 + $0x4c8] sm:$0xff] %v1201_v27  ;;  %v1205_v33 = vmul.f32 0.16666667, %v948_v23  ;;  %v949_v34 = vmin.f32 %v693_v28, 6.0  ;;  %v950_v35 = vmin.f32 %v694_v29, 6.0 }
  0xce   :  { %1458 = vst [vmem:[#allocation5 + $0x4d0] sm:$0xff] %v1202_v30  ;;  %1459 = vst [vmem:[#allocation5 + $0x4d8] sm:$0xff] %v1203_v31  ;;  %v440_v37 = vadd.f32 3.0, %v184_v17  ;;  %v441_v38 = vadd.f32 3.0, %v185_v18  ;;  %v442_v39 = vadd.f32 3.0, %v186_v19  ;;  %v443_v40 = vadd.f32 3.0, %v187_v24 }
  0xcf   :  { %1460 = vst [vmem:[#allocation5 + $0x4e0] sm:$0xff] %v1204_v32  ;;  %v189_v41 = vld [vmem:[#allocation2 + $0x530] sm:$0xff]  ;;  %v190_v42 = vld [vmem:[#allocation2 + $0x538] sm:$0xff]  ;;  %1461 = vst [vmem:[#allocation5 + $0x4e8] sm:$0xff] %v1205_v33  ;;  %v1206_v43 = vmul.f32 0.16666667, %v949_v34 }
  0xd0   :  { %v1207_v44 = vmul.f32 0.16666667, %v950_v35  ;;  %v695_v45 = vmax.f32 %v439_v36, 0.0  ;;  %v444_v46 = vadd.f32 3.0, %v188_v25  ;;  %v696_v47 = vmax.f32 %v440_v37, 0.0  ;;  %v191_v55 = vld [vmem:[#allocation2 + $0x540] sm:$0xff] }
  0xd1   :  { %v697_v48 = vmax.f32 %v441_v38, 0.0  ;;  %v698_v49 = vmax.f32 %v442_v39, 0.0  ;;  %v699_v50 = vmax.f32 %v443_v40, 0.0  ;;  %1462 = vst [vmem:[#allocation5 + $0x4f0] sm:$0xff] %v1206_v43  ;;  %v445_v53 = vadd.f32 3.0, %v189_v41  ;;  %v192_v56 = vld [vmem:[#allocation2 + $0x548] sm:$0xff] }
  0xd2   :  { %1463 = vst [vmem:[#allocation5 + $0x4f8] sm:$0xff] %v1207_v44  ;;  %v951_v51 = vmin.f32 %v695_v45, 6.0  ;;  %v700_v52 = vmax.f32 %v444_v46, 0.0  ;;  %v446_v54 = vadd.f32 3.0, %v190_v42  ;;  %v193_v57 = vld [vmem:[#allocation2 + $0x550] sm:$0xff]  ;;  %v952_v58 = vmin.f32 %v696_v47, 6.0 }
  0xd3   :  { %v953_v59 = vmin.f32 %v697_v48, 6.0  ;;  %v954_v60 = vmin.f32 %v698_v49, 6.0  ;;  %v955_v61 = vmin.f32 %v699_v50, 6.0  ;;  %v194_v62 = vld [vmem:[#allocation2 + $0x558] sm:$0xff]  ;;  %v195_v63 = vld [vmem:[#allocation2 + $0x560] sm:$0xff]  ;;  %v701_v2 = vmax.f32 %v445_v53, 0.0 }
  0xd4   :  { %v1208_v0 = vmul.f32 0.16666667, %v951_v51  ;;  %v956_v1 = vmin.f32 %v700_v52, 6.0  ;;  %v702_v3 = vmax.f32 %v446_v54, 0.0  ;;  %v196_v4 = vld [vmem:[#allocation2 + $0x568] sm:$0xff]  ;;  %v447_v12 = vadd.f32 3.0, %v191_v55 }
  0xd5   :  { %v1209_v5 = vmul.f32 0.16666667, %v952_v58  ;;  %v1210_v6 = vmul.f32 0.16666667, %v953_v59  ;;  %v1211_v7 = vmul.f32 0.16666667, %v954_v60 }
  0xd6   :  { %1464 = vst [vmem:[#allocation5 + $0x500] sm:$0xff] %v1208_v0  ;;  %v1212_v8 = vmul.f32 0.16666667, %v955_v61  ;;  %v1213_v9 = vmul.f32 0.16666667, %v956_v1  ;;  %v957_v10 = vmin.f32 %v701_v2, 6.0 }
  0xd7   :  { %v958_v11 = vmin.f32 %v702_v3, 6.0  ;;  %1465 = vst [vmem:[#allocation5 + $0x508] sm:$0xff] %v1209_v5  ;;  %1466 = vst [vmem:[#allocation5 + $0x510] sm:$0xff] %v1210_v6  ;;  %v448_v13 = vadd.f32 3.0, %v192_v56  ;;  %v449_v14 = vadd.f32 3.0, %v193_v57  ;;  %v450_v15 = vadd.f32 3.0, %v194_v62 }
  0xd8   :  { %1467 = vst [vmem:[#allocation5 + $0x518] sm:$0xff] %v1211_v7  ;;  %v197_v16 = vld [vmem:[#allocation2 + $0x570] sm:$0xff]  ;;  %v198_v17 = vld [vmem:[#allocation2 + $0x578] sm:$0xff]  ;;  %1468 = vst [vmem:[#allocation5 + $0x520] sm:$0xff] %v1212_v8  ;;  %v1214_v18 = vmul.f32 0.16666667, %v957_v10 }
  0xd9   :  { %1469 = vst [vmem:[#allocation5 + $0x528] sm:$0xff] %v1213_v9  ;;  %v1215_v19 = vmul.f32 0.16666667, %v958_v11  ;;  %v451_v20 = vadd.f32 3.0, %v195_v63  ;;  %v452_v21 = vadd.f32 3.0, %v196_v4  ;;  %v703_v22 = vmax.f32 %v447_v12, 0.0 }
  0xda   :  { %v704_v23 = vmax.f32 %v448_v13, 0.0  ;;  %v705_v24 = vmax.f32 %v449_v14, 0.0  ;;  %v706_v25 = vmax.f32 %v450_v15, 0.0  ;;  %1470 = vst [vmem:[#allocation5 + $0x530] sm:$0xff] %v1214_v18  ;;  %v453_v28 = vadd.f32 3.0, %v197_v16  ;;  %v199_v30 = vld [vmem:[#allocation2 + $0x580] sm:$0xff] }
  0xdb   :  { %1471 = vst [vmem:[#allocation5 + $0x538] sm:$0xff] %v1215_v19  ;;  %v707_v26 = vmax.f32 %v451_v20, 0.0  ;;  %v708_v27 = vmax.f32 %v452_v21, 0.0  ;;  %v454_v29 = vadd.f32 3.0, %v198_v17  ;;  %v200_v31 = vld [vmem:[#allocation2 + $0x588] sm:$0xff]  ;;  %v959_v32 = vmin.f32 %v703_v22, 6.0 }
  0xdc   :  { %v960_v33 = vmin.f32 %v704_v23, 6.0  ;;  %v961_v34 = vmin.f32 %v705_v24, 6.0  ;;  %v962_v35 = vmin.f32 %v706_v25, 6.0  ;;  %v201_v36 = vld [vmem:[#allocation2 + $0x590] sm:$0xff]  ;;  %v202_v37 = vld [vmem:[#allocation2 + $0x598] sm:$0xff]  ;;  %v709_v40 = vmax.f32 %v453_v28, 0.0 }
  0xdd   :  { %v963_v38 = vmin.f32 %v707_v26, 6.0  ;;  %v964_v39 = vmin.f32 %v708_v27, 6.0  ;;  %v710_v41 = vmax.f32 %v454_v29, 0.0  ;;  %v203_v42 = vld [vmem:[#allocation2 + $0x5a0] sm:$0xff]  ;;  %v204_v43 = vld [vmem:[#allocation2 + $0x5a8] sm:$0xff]  ;;  %v455_v52 = vadd.f32 3.0, %v199_v30 }
  0xde   :  { %v1216_v44 = vmul.f32 0.16666667, %v959_v32  ;;  %v1217_v45 = vmul.f32 0.16666667, %v960_v33  ;;  %v1218_v46 = vmul.f32 0.16666667, %v961_v34 }
  0xdf   :  { %v1219_v47 = vmul.f32 0.16666667, %v962_v35  ;;  %v1220_v48 = vmul.f32 0.16666667, %v963_v38  ;;  %v1221_v49 = vmul.f32 0.16666667, %v964_v39 }
  0xe0   :  { %1472 = vst [vmem:[#allocation5 + $0x540] sm:$0xff] %v1216_v44  ;;  %1473 = vst [vmem:[#allocation5 + $0x548] sm:$0xff] %v1217_v45  ;;  %v965_v50 = vmin.f32 %v709_v40, 6.0  ;;  %v966_v51 = vmin.f32 %v710_v41, 6.0  ;;  %v456_v53 = vadd.f32 3.0, %v200_v31  ;;  %v457_v54 = vadd.f32 3.0, %v201_v36 }
  0xe1   :  { %1474 = vst [vmem:[#allocation5 + $0x550] sm:$0xff] %v1218_v46  ;;  %1475 = vst [vmem:[#allocation5 + $0x558] sm:$0xff] %v1219_v47  ;;  %v458_v55 = vadd.f32 3.0, %v202_v37  ;;  %v459_v56 = vadd.f32 3.0, %v203_v42  ;;  %v460_v57 = vadd.f32 3.0, %v204_v43  ;;  %v205_v58 = vld [vmem:[#allocation2 + $0x5b0] sm:$0xff] }
  0xe2   :  { %1476 = vst [vmem:[#allocation5 + $0x560] sm:$0xff] %v1220_v48  ;;  %1477 = vst [vmem:[#allocation5 + $0x568] sm:$0xff] %v1221_v49  ;;  %v206_v59 = vld [vmem:[#allocation2 + $0x5b8] sm:$0xff]  ;;  %v1222_v60 = vmul.f32 0.16666667, %v965_v50  ;;  %v711_v62 = vmax.f32 %v455_v52, 0.0 }
  0xe3   :  { %v1223_v61 = vmul.f32 0.16666667, %v966_v51  ;;  %v712_v63 = vmax.f32 %v456_v53, 0.0  ;;  %v713_v0 = vmax.f32 %v457_v54, 0.0  ;;  %v714_v1 = vmax.f32 %v458_v55, 0.0  ;;  %v207_v4 = vld [vmem:[#allocation2 + $0x5c0] sm:$0xff] }
  0xe4   :  { %v715_v2 = vmax.f32 %v459_v56, 0.0  ;;  %v716_v3 = vmax.f32 %v460_v57, 0.0  ;;  %1478 = vst [vmem:[#allocation5 + $0x570] sm:$0xff] %v1222_v60  ;;  %v967_v5 = vmin.f32 %v711_v62, 6.0  ;;  %v461_v7 = vadd.f32 3.0, %v205_v58  ;;  %v208_v9 = vld [vmem:[#allocation2 + $0x5c8] sm:$0xff] }
  0xe5   :  { %1479 = vst [vmem:[#allocation5 + $0x578] sm:$0xff] %v1223_v61  ;;  %v968_v6 = vmin.f32 %v712_v63, 6.0  ;;  %v462_v8 = vadd.f32 3.0, %v206_v59  ;;  %v209_v10 = vld [vmem:[#allocation2 + $0x5d0] sm:$0xff]  ;;  %v210_v11 = vld [vmem:[#allocation2 + $0x5d8] sm:$0xff]  ;;  %v969_v12 = vmin.f32 %v713_v0, 6.0 }
  0xe6   :  { %v970_v13 = vmin.f32 %v714_v1, 6.0  ;;  %v971_v14 = vmin.f32 %v715_v2, 6.0  ;;  %v972_v15 = vmin.f32 %v716_v3, 6.0  ;;  %v211_v16 = vld [vmem:[#allocation2 + $0x5e0] sm:$0xff]  ;;  %v212_v17 = vld [vmem:[#allocation2 + $0x5e8] sm:$0xff]  ;;  %v717_v20 = vmax.f32 %v461_v7, 0.0 }
  0xe7   :  { %v1224_v18 = vmul.f32 0.16666667, %v967_v5  ;;  %v1225_v19 = vmul.f32 0.16666667, %v968_v6  ;;  %v718_v21 = vmax.f32 %v462_v8, 0.0  ;;  %v463_v28 = vadd.f32 3.0, %v207_v4 }
  0xe8   :  { %v1226_v22 = vmul.f32 0.16666667, %v969_v12  ;;  %v1227_v23 = vmul.f32 0.16666667, %v970_v13  ;;  %v1228_v24 = vmul.f32 0.16666667, %v971_v14 }
  0xe9   :  { %1480 = vst [vmem:[#allocation5 + $0x580] sm:$0xff] %v1224_v18  ;;  %1481 = vst [vmem:[#allocation5 + $0x588] sm:$0xff] %v1225_v19  ;;  %v1229_v25 = vmul.f32 0.16666667, %v972_v15  ;;  %v973_v26 = vmin.f32 %v717_v20, 6.0  ;;  %v974_v27 = vmin.f32 %v718_v21, 6.0 }
  0xea   :  { %1482 = vst [vmem:[#allocation5 + $0x590] sm:$0xff] %v1226_v22  ;;  %1483 = vst [vmem:[#allocation5 + $0x598] sm:$0xff] %v1227_v23  ;;  %v464_v29 = vadd.f32 3.0, %v208_v9  ;;  %v465_v30 = vadd.f32 3.0, %v209_v10  ;;  %v466_v31 = vadd.f32 3.0, %v210_v11  ;;  %v467_v32 = vadd.f32 3.0, %v211_v16 }
  0xeb   :  { %1484 = vst [vmem:[#allocation5 + $0x5a0] sm:$0xff] %v1228_v24  ;;  %v213_v33 = vld [vmem:[#allocation2 + $0x5f0] sm:$0xff]  ;;  %v214_v34 = vld [vmem:[#allocation2 + $0x5f8] sm:$0xff]  ;;  %1485 = vst [vmem:[#allocation5 + $0x5a8] sm:$0xff] %v1229_v25  ;;  %v1230_v35 = vmul.f32 0.16666667, %v973_v26 }
  0xec   :  { %v1231_v36 = vmul.f32 0.16666667, %v974_v27  ;;  %v719_v37 = vmax.f32 %v463_v28, 0.0  ;;  %v468_v38 = vadd.f32 3.0, %v212_v17  ;;  %v720_v39 = vmax.f32 %v464_v29, 0.0  ;;  %v215_v47 = vld [vmem:[#allocation2 + $0x600] sm:$0xff] }
  0xed   :  { %v721_v40 = vmax.f32 %v465_v30, 0.0  ;;  %v722_v41 = vmax.f32 %v466_v31, 0.0  ;;  %v723_v42 = vmax.f32 %v467_v32, 0.0  ;;  %1486 = vst [vmem:[#allocation5 + $0x5b0] sm:$0xff] %v1230_v35  ;;  %v469_v45 = vadd.f32 3.0, %v213_v33  ;;  %v216_v48 = vld [vmem:[#allocation2 + $0x608] sm:$0xff] }
  0xee   :  { %1487 = vst [vmem:[#allocation5 + $0x5b8] sm:$0xff] %v1231_v36  ;;  %v975_v43 = vmin.f32 %v719_v37, 6.0  ;;  %v724_v44 = vmax.f32 %v468_v38, 0.0  ;;  %v470_v46 = vadd.f32 3.0, %v214_v34  ;;  %v217_v49 = vld [vmem:[#allocation2 + $0x610] sm:$0xff]  ;;  %v976_v50 = vmin.f32 %v720_v39, 6.0 }
  0xef   :  { %v977_v51 = vmin.f32 %v721_v40, 6.0  ;;  %v978_v52 = vmin.f32 %v722_v41, 6.0  ;;  %v979_v53 = vmin.f32 %v723_v42, 6.0  ;;  %v218_v54 = vld [vmem:[#allocation2 + $0x618] sm:$0xff]  ;;  %v219_v55 = vld [vmem:[#allocation2 + $0x620] sm:$0xff]  ;;  %v725_v58 = vmax.f32 %v469_v45, 0.0 }
  0xf0   :  { %v1232_v56 = vmul.f32 0.16666667, %v975_v43  ;;  %v980_v57 = vmin.f32 %v724_v44, 6.0  ;;  %v726_v59 = vmax.f32 %v470_v46, 0.0  ;;  %v220_v60 = vld [vmem:[#allocation2 + $0x628] sm:$0xff]  ;;  %v471_v4 = vadd.f32 3.0, %v215_v47 }
  0xf1   :  { %v1233_v61 = vmul.f32 0.16666667, %v976_v50  ;;  %v1234_v62 = vmul.f32 0.16666667, %v977_v51  ;;  %v1235_v63 = vmul.f32 0.16666667, %v978_v52 }
  0xf2   :  { %1488 = vst [vmem:[#allocation5 + $0x5c0] sm:$0xff] %v1232_v56  ;;  %v1236_v0 = vmul.f32 0.16666667, %v979_v53  ;;  %v1237_v1 = vmul.f32 0.16666667, %v980_v57  ;;  %v981_v2 = vmin.f32 %v725_v58, 6.0 }
  0xf3   :  { %v982_v3 = vmin.f32 %v726_v59, 6.0  ;;  %1489 = vst [vmem:[#allocation5 + $0x5c8] sm:$0xff] %v1233_v61  ;;  %1490 = vst [vmem:[#allocation5 + $0x5d0] sm:$0xff] %v1234_v62  ;;  %v472_v5 = vadd.f32 3.0, %v216_v48  ;;  %v473_v6 = vadd.f32 3.0, %v217_v49  ;;  %v474_v7 = vadd.f32 3.0, %v218_v54 }
  0xf4   :  { %1491 = vst [vmem:[#allocation5 + $0x5d8] sm:$0xff] %v1235_v63  ;;  %v221_v8 = vld [vmem:[#allocation2 + $0x630] sm:$0xff]  ;;  %v222_v9 = vld [vmem:[#allocation2 + $0x638] sm:$0xff]  ;;  %1492 = vst [vmem:[#allocation5 + $0x5e0] sm:$0xff] %v1236_v0  ;;  %v1238_v10 = vmul.f32 0.16666667, %v981_v2 }
  0xf5   :  { %1493 = vst [vmem:[#allocation5 + $0x5e8] sm:$0xff] %v1237_v1  ;;  %v1239_v11 = vmul.f32 0.16666667, %v982_v3  ;;  %v475_v12 = vadd.f32 3.0, %v219_v55  ;;  %v476_v13 = vadd.f32 3.0, %v220_v60  ;;  %v727_v14 = vmax.f32 %v471_v4, 0.0 }
  0xf6   :  { %v728_v15 = vmax.f32 %v472_v5, 0.0  ;;  %v729_v16 = vmax.f32 %v473_v6, 0.0  ;;  %v730_v17 = vmax.f32 %v474_v7, 0.0  ;;  %1494 = vst [vmem:[#allocation5 + $0x5f0] sm:$0xff] %v1238_v10  ;;  %v477_v20 = vadd.f32 3.0, %v221_v8  ;;  %v223_v22 = vld [vmem:[#allocation2 + $0x640] sm:$0xff] }
  0xf7   :  { %1495 = vst [vmem:[#allocation5 + $0x5f8] sm:$0xff] %v1239_v11  ;;  %v731_v18 = vmax.f32 %v475_v12, 0.0  ;;  %v732_v19 = vmax.f32 %v476_v13, 0.0  ;;  %v478_v21 = vadd.f32 3.0, %v222_v9  ;;  %v224_v23 = vld [vmem:[#allocation2 + $0x648] sm:$0xff]  ;;  %v983_v24 = vmin.f32 %v727_v14, 6.0 }
  0xf8   :  { %v984_v25 = vmin.f32 %v728_v15, 6.0  ;;  %v985_v26 = vmin.f32 %v729_v16, 6.0  ;;  %v986_v27 = vmin.f32 %v730_v17, 6.0  ;;  %v225_v28 = vld [vmem:[#allocation2 + $0x650] sm:$0xff]  ;;  %v226_v29 = vld [vmem:[#allocation2 + $0x658] sm:$0xff]  ;;  %v733_v32 = vmax.f32 %v477_v20, 0.0 }
  0xf9   :  { %v987_v30 = vmin.f32 %v731_v18, 6.0  ;;  %v988_v31 = vmin.f32 %v732_v19, 6.0  ;;  %v734_v33 = vmax.f32 %v478_v21, 0.0  ;;  %v227_v34 = vld [vmem:[#allocation2 + $0x660] sm:$0xff]  ;;  %v228_v35 = vld [vmem:[#allocation2 + $0x668] sm:$0xff]  ;;  %v479_v44 = vadd.f32 3.0, %v223_v22 }
  0xfa   :  { %v1240_v36 = vmul.f32 0.16666667, %v983_v24  ;;  %v1241_v37 = vmul.f32 0.16666667, %v984_v25  ;;  %v1242_v38 = vmul.f32 0.16666667, %v985_v26 }
  0xfb   :  { %v1243_v39 = vmul.f32 0.16666667, %v986_v27  ;;  %v1244_v40 = vmul.f32 0.16666667, %v987_v30  ;;  %v1245_v41 = vmul.f32 0.16666667, %v988_v31 }
  0xfc   :  { %1496 = vst [vmem:[#allocation5 + $0x600] sm:$0xff] %v1240_v36  ;;  %1497 = vst [vmem:[#allocation5 + $0x608] sm:$0xff] %v1241_v37  ;;  %v989_v42 = vmin.f32 %v733_v32, 6.0  ;;  %v990_v43 = vmin.f32 %v734_v33, 6.0  ;;  %v480_v45 = vadd.f32 3.0, %v224_v23  ;;  %v481_v46 = vadd.f32 3.0, %v225_v28 }
  0xfd   :  { %1498 = vst [vmem:[#allocation5 + $0x610] sm:$0xff] %v1242_v38  ;;  %1499 = vst [vmem:[#allocation5 + $0x618] sm:$0xff] %v1243_v39  ;;  %v482_v47 = vadd.f32 3.0, %v226_v29  ;;  %v483_v48 = vadd.f32 3.0, %v227_v34  ;;  %v484_v49 = vadd.f32 3.0, %v228_v35  ;;  %v229_v50 = vld [vmem:[#allocation2 + $0x670] sm:$0xff] }
  0xfe   :  { %1500 = vst [vmem:[#allocation5 + $0x620] sm:$0xff] %v1244_v40  ;;  %1501 = vst [vmem:[#allocation5 + $0x628] sm:$0xff] %v1245_v41  ;;  %v230_v51 = vld [vmem:[#allocation2 + $0x678] sm:$0xff]  ;;  %v1246_v52 = vmul.f32 0.16666667, %v989_v42  ;;  %v735_v54 = vmax.f32 %v479_v44, 0.0 }
  0xff   :  { %v1247_v53 = vmul.f32 0.16666667, %v990_v43  ;;  %v736_v55 = vmax.f32 %v480_v45, 0.0  ;;  %v737_v56 = vmax.f32 %v481_v46, 0.0  ;;  %v738_v57 = vmax.f32 %v482_v47, 0.0  ;;  %v231_v60 = vld [vmem:[#allocation2 + $0x680] sm:$0xff] }
 0x100   :  { %v739_v58 = vmax.f32 %v483_v48, 0.0  ;;  %v740_v59 = vmax.f32 %v484_v49, 0.0  ;;  %1502 = vst [vmem:[#allocation5 + $0x630] sm:$0xff] %v1246_v52  ;;  %v991_v61 = vmin.f32 %v735_v54, 6.0  ;;  %v485_v63 = vadd.f32 3.0, %v229_v50  ;;  %v232_v1 = vld [vmem:[#allocation2 + $0x688] sm:$0xff] }
 0x101   :  { %1503 = vst [vmem:[#allocation5 + $0x638] sm:$0xff] %v1247_v53  ;;  %v992_v62 = vmin.f32 %v736_v55, 6.0  ;;  %v486_v0 = vadd.f32 3.0, %v230_v51  ;;  %v233_v2 = vld [vmem:[#allocation2 + $0x690] sm:$0xff]  ;;  %v234_v3 = vld [vmem:[#allocation2 + $0x698] sm:$0xff]  ;;  %v993_v4 = vmin.f32 %v737_v56, 6.0 }
 0x102   :  { %v994_v5 = vmin.f32 %v738_v57, 6.0  ;;  %v995_v6 = vmin.f32 %v739_v58, 6.0  ;;  %v996_v7 = vmin.f32 %v740_v59, 6.0  ;;  %v235_v8 = vld [vmem:[#allocation2 + $0x6a0] sm:$0xff]  ;;  %v236_v9 = vld [vmem:[#allocation2 + $0x6a8] sm:$0xff]  ;;  %v741_v12 = vmax.f32 %v485_v63, 0.0 }
 0x103   :  { %v1248_v10 = vmul.f32 0.16666667, %v991_v61  ;;  %v1249_v11 = vmul.f32 0.16666667, %v992_v62  ;;  %v742_v13 = vmax.f32 %v486_v0, 0.0  ;;  %v487_v20 = vadd.f32 3.0, %v231_v60 }
 0x104   :  { %v1250_v14 = vmul.f32 0.16666667, %v993_v4  ;;  %v1251_v15 = vmul.f32 0.16666667, %v994_v5  ;;  %v1252_v16 = vmul.f32 0.16666667, %v995_v6 }
 0x105   :  { %1504 = vst [vmem:[#allocation5 + $0x640] sm:$0xff] %v1248_v10  ;;  %1505 = vst [vmem:[#allocation5 + $0x648] sm:$0xff] %v1249_v11  ;;  %v1253_v17 = vmul.f32 0.16666667, %v996_v7  ;;  %v997_v18 = vmin.f32 %v741_v12, 6.0  ;;  %v998_v19 = vmin.f32 %v742_v13, 6.0 }
 0x106   :  { %1506 = vst [vmem:[#allocation5 + $0x650] sm:$0xff] %v1250_v14  ;;  %1507 = vst [vmem:[#allocation5 + $0x658] sm:$0xff] %v1251_v15  ;;  %v488_v21 = vadd.f32 3.0, %v232_v1  ;;  %v489_v22 = vadd.f32 3.0, %v233_v2  ;;  %v490_v23 = vadd.f32 3.0, %v234_v3  ;;  %v491_v24 = vadd.f32 3.0, %v235_v8 }
 0x107   :  { %1508 = vst [vmem:[#allocation5 + $0x660] sm:$0xff] %v1252_v16  ;;  %v237_v25 = vld [vmem:[#allocation2 + $0x6b0] sm:$0xff]  ;;  %v238_v26 = vld [vmem:[#allocation2 + $0x6b8] sm:$0xff]  ;;  %1509 = vst [vmem:[#allocation5 + $0x668] sm:$0xff] %v1253_v17  ;;  %v1254_v27 = vmul.f32 0.16666667, %v997_v18 }
 0x108   :  { %v1255_v28 = vmul.f32 0.16666667, %v998_v19  ;;  %v743_v29 = vmax.f32 %v487_v20, 0.0  ;;  %v492_v30 = vadd.f32 3.0, %v236_v9  ;;  %v744_v31 = vmax.f32 %v488_v21, 0.0  ;;  %v239_v39 = vld [vmem:[#allocation2 + $0x6c0] sm:$0xff] }
 0x109   :  { %v745_v32 = vmax.f32 %v489_v22, 0.0  ;;  %v746_v33 = vmax.f32 %v490_v23, 0.0  ;;  %v747_v34 = vmax.f32 %v491_v24, 0.0  ;;  %1510 = vst [vmem:[#allocation5 + $0x670] sm:$0xff] %v1254_v27  ;;  %v493_v37 = vadd.f32 3.0, %v237_v25  ;;  %v240_v40 = vld [vmem:[#allocation2 + $0x6c8] sm:$0xff] }
 0x10a   :  { %1511 = vst [vmem:[#allocation5 + $0x678] sm:$0xff] %v1255_v28  ;;  %v999_v35 = vmin.f32 %v743_v29, 6.0  ;;  %v748_v36 = vmax.f32 %v492_v30, 0.0  ;;  %v494_v38 = vadd.f32 3.0, %v238_v26  ;;  %v241_v41 = vld [vmem:[#allocation2 + $0x6d0] sm:$0xff]  ;;  %v1000_v42 = vmin.f32 %v744_v31, 6.0 }
 0x10b   :  { %v1001_v43 = vmin.f32 %v745_v32, 6.0  ;;  %v1002_v44 = vmin.f32 %v746_v33, 6.0  ;;  %v1003_v45 = vmin.f32 %v747_v34, 6.0  ;;  %v242_v46 = vld [vmem:[#allocation2 + $0x6d8] sm:$0xff]  ;;  %v243_v47 = vld [vmem:[#allocation2 + $0x6e0] sm:$0xff]  ;;  %v749_v50 = vmax.f32 %v493_v37, 0.0 }
 0x10c   :  { %v1256_v48 = vmul.f32 0.16666667, %v999_v35  ;;  %v1004_v49 = vmin.f32 %v748_v36, 6.0  ;;  %v750_v51 = vmax.f32 %v494_v38, 0.0  ;;  %v244_v52 = vld [vmem:[#allocation2 + $0x6e8] sm:$0xff]  ;;  %v495_v60 = vadd.f32 3.0, %v239_v39 }
 0x10d   :  { %v1257_v53 = vmul.f32 0.16666667, %v1000_v42  ;;  %v1258_v54 = vmul.f32 0.16666667, %v1001_v43  ;;  %v1259_v55 = vmul.f32 0.16666667, %v1002_v44 }
 0x10e   :  { %1512 = vst [vmem:[#allocation5 + $0x680] sm:$0xff] %v1256_v48  ;;  %v1260_v56 = vmul.f32 0.16666667, %v1003_v45  ;;  %v1261_v57 = vmul.f32 0.16666667, %v1004_v49  ;;  %v1005_v58 = vmin.f32 %v749_v50, 6.0 }
 0x10f   :  { %v1006_v59 = vmin.f32 %v750_v51, 6.0  ;;  %1513 = vst [vmem:[#allocation5 + $0x688] sm:$0xff] %v1257_v53  ;;  %1514 = vst [vmem:[#allocation5 + $0x690] sm:$0xff] %v1258_v54  ;;  %v496_v61 = vadd.f32 3.0, %v240_v40  ;;  %v497_v62 = vadd.f32 3.0, %v241_v41  ;;  %v498_v63 = vadd.f32 3.0, %v242_v46 }
 0x110   :  { %1515 = vst [vmem:[#allocation5 + $0x698] sm:$0xff] %v1259_v55  ;;  %v245_v0 = vld [vmem:[#allocation2 + $0x6f0] sm:$0xff]  ;;  %v246_v1 = vld [vmem:[#allocation2 + $0x6f8] sm:$0xff]  ;;  %1516 = vst [vmem:[#allocation5 + $0x6a0] sm:$0xff] %v1260_v56  ;;  %v1262_v2 = vmul.f32 0.16666667, %v1005_v58 }
 0x111   :  { %1517 = vst [vmem:[#allocation5 + $0x6a8] sm:$0xff] %v1261_v57  ;;  %v1263_v3 = vmul.f32 0.16666667, %v1006_v59  ;;  %v499_v4 = vadd.f32 3.0, %v243_v47  ;;  %v500_v5 = vadd.f32 3.0, %v244_v52  ;;  %v751_v6 = vmax.f32 %v495_v60, 0.0 }
 0x112   :  { %v752_v7 = vmax.f32 %v496_v61, 0.0  ;;  %v753_v8 = vmax.f32 %v497_v62, 0.0  ;;  %v754_v9 = vmax.f32 %v498_v63, 0.0  ;;  %1518 = vst [vmem:[#allocation5 + $0x6b0] sm:$0xff] %v1262_v2  ;;  %v501_v12 = vadd.f32 3.0, %v245_v0  ;;  %v247_v14 = vld [vmem:[#allocation2 + $0x700] sm:$0xff] }
 0x113   :  { %1519 = vst [vmem:[#allocation5 + $0x6b8] sm:$0xff] %v1263_v3  ;;  %v755_v10 = vmax.f32 %v499_v4, 0.0  ;;  %v756_v11 = vmax.f32 %v500_v5, 0.0  ;;  %v502_v13 = vadd.f32 3.0, %v246_v1  ;;  %v248_v15 = vld [vmem:[#allocation2 + $0x708] sm:$0xff]  ;;  %v1007_v16 = vmin.f32 %v751_v6, 6.0 }
 0x114   :  { %v1008_v17 = vmin.f32 %v752_v7, 6.0  ;;  %v1009_v18 = vmin.f32 %v753_v8, 6.0  ;;  %v1010_v19 = vmin.f32 %v754_v9, 6.0  ;;  %v249_v20 = vld [vmem:[#allocation2 + $0x710] sm:$0xff]  ;;  %v250_v21 = vld [vmem:[#allocation2 + $0x718] sm:$0xff]  ;;  %v757_v24 = vmax.f32 %v501_v12, 0.0 }
 0x115   :  { %v1011_v22 = vmin.f32 %v755_v10, 6.0  ;;  %v1012_v23 = vmin.f32 %v756_v11, 6.0  ;;  %v758_v25 = vmax.f32 %v502_v13, 0.0  ;;  %v251_v26 = vld [vmem:[#allocation2 + $0x720] sm:$0xff]  ;;  %v252_v27 = vld [vmem:[#allocation2 + $0x728] sm:$0xff]  ;;  %v503_v36 = vadd.f32 3.0, %v247_v14 }
 0x116   :  { %v1264_v28 = vmul.f32 0.16666667, %v1007_v16  ;;  %v1265_v29 = vmul.f32 0.16666667, %v1008_v17  ;;  %v1266_v30 = vmul.f32 0.16666667, %v1009_v18 }
 0x117   :  { %v1267_v31 = vmul.f32 0.16666667, %v1010_v19  ;;  %v1268_v32 = vmul.f32 0.16666667, %v1011_v22  ;;  %v1269_v33 = vmul.f32 0.16666667, %v1012_v23 }
 0x118   :  { %1520 = vst [vmem:[#allocation5 + $0x6c0] sm:$0xff] %v1264_v28  ;;  %1521 = vst [vmem:[#allocation5 + $0x6c8] sm:$0xff] %v1265_v29  ;;  %v1013_v34 = vmin.f32 %v757_v24, 6.0  ;;  %v1014_v35 = vmin.f32 %v758_v25, 6.0  ;;  %v504_v37 = vadd.f32 3.0, %v248_v15  ;;  %v505_v38 = vadd.f32 3.0, %v249_v20 }
 0x119   :  { %1522 = vst [vmem:[#allocation5 + $0x6d0] sm:$0xff] %v1266_v30  ;;  %1523 = vst [vmem:[#allocation5 + $0x6d8] sm:$0xff] %v1267_v31  ;;  %v506_v39 = vadd.f32 3.0, %v250_v21  ;;  %v507_v40 = vadd.f32 3.0, %v251_v26  ;;  %v508_v41 = vadd.f32 3.0, %v252_v27  ;;  %v253_v42 = vld [vmem:[#allocation2 + $0x730] sm:$0xff] }
 0x11a   :  { %1524 = vst [vmem:[#allocation5 + $0x6e0] sm:$0xff] %v1268_v32  ;;  %1525 = vst [vmem:[#allocation5 + $0x6e8] sm:$0xff] %v1269_v33  ;;  %v254_v43 = vld [vmem:[#allocation2 + $0x738] sm:$0xff]  ;;  %v1270_v44 = vmul.f32 0.16666667, %v1013_v34  ;;  %v759_v46 = vmax.f32 %v503_v36, 0.0 }
 0x11b   :  { %v1271_v45 = vmul.f32 0.16666667, %v1014_v35  ;;  %v760_v47 = vmax.f32 %v504_v37, 0.0  ;;  %v761_v48 = vmax.f32 %v505_v38, 0.0  ;;  %v762_v49 = vmax.f32 %v506_v39, 0.0  ;;  %v255_v52 = vld [vmem:[#allocation2 + $0x740] sm:$0xff] }
 0x11c   :  { %v763_v50 = vmax.f32 %v507_v40, 0.0  ;;  %v764_v51 = vmax.f32 %v508_v41, 0.0  ;;  %1526 = vst [vmem:[#allocation5 + $0x6f0] sm:$0xff] %v1270_v44  ;;  %v1015_v53 = vmin.f32 %v759_v46, 6.0  ;;  %v509_v55 = vadd.f32 3.0, %v253_v42  ;;  %v256_v57 = vld [vmem:[#allocation2 + $0x748] sm:$0xff] }
 0x11d   :  { %1527 = vst [vmem:[#allocation5 + $0x6f8] sm:$0xff] %v1271_v45  ;;  %v1016_v54 = vmin.f32 %v760_v47, 6.0  ;;  %v510_v56 = vadd.f32 3.0, %v254_v43  ;;  %v257_v58 = vld [vmem:[#allocation2 + $0x750] sm:$0xff]  ;;  %v258_v59 = vld [vmem:[#allocation2 + $0x758] sm:$0xff]  ;;  %v1017_v60 = vmin.f32 %v761_v48, 6.0 }
 0x11e   :  { %v1018_v61 = vmin.f32 %v762_v49, 6.0  ;;  %v1019_v62 = vmin.f32 %v763_v50, 6.0  ;;  %v1020_v63 = vmin.f32 %v764_v51, 6.0  ;;  %v259_v0 = vld [vmem:[#allocation2 + $0x760] sm:$0xff]  ;;  %v260_v1 = vld [vmem:[#allocation2 + $0x768] sm:$0xff]  ;;  %v765_v4 = vmax.f32 %v509_v55, 0.0 }
 0x11f   :  { %v1272_v2 = vmul.f32 0.16666667, %v1015_v53  ;;  %v1273_v3 = vmul.f32 0.16666667, %v1016_v54  ;;  %v766_v5 = vmax.f32 %v510_v56, 0.0  ;;  %v511_v12 = vadd.f32 3.0, %v255_v52 }
 0x120   :  { %v1274_v6 = vmul.f32 0.16666667, %v1017_v60  ;;  %v1275_v7 = vmul.f32 0.16666667, %v1018_v61  ;;  %v1276_v8 = vmul.f32 0.16666667, %v1019_v62 }
 0x121   :  { %1528 = vst [vmem:[#allocation5 + $0x700] sm:$0xff] %v1272_v2  ;;  %1529 = vst [vmem:[#allocation5 + $0x708] sm:$0xff] %v1273_v3  ;;  %v1277_v9 = vmul.f32 0.16666667, %v1020_v63  ;;  %v1021_v10 = vmin.f32 %v765_v4, 6.0  ;;  %v1022_v11 = vmin.f32 %v766_v5, 6.0 }
 0x122   :  { %1530 = vst [vmem:[#allocation5 + $0x710] sm:$0xff] %v1274_v6  ;;  %1531 = vst [vmem:[#allocation5 + $0x718] sm:$0xff] %v1275_v7  ;;  %v512_v13 = vadd.f32 3.0, %v256_v57  ;;  %v513_v14 = vadd.f32 3.0, %v257_v58  ;;  %v514_v15 = vadd.f32 3.0, %v258_v59  ;;  %v515_v16 = vadd.f32 3.0, %v259_v0 }
 0x123   :  { %1532 = vst [vmem:[#allocation5 + $0x720] sm:$0xff] %v1276_v8  ;;  %v261_v17 = vld [vmem:[#allocation2 + $0x770] sm:$0xff]  ;;  %v262_v18 = vld [vmem:[#allocation2 + $0x778] sm:$0xff]  ;;  %1533 = vst [vmem:[#allocation5 + $0x728] sm:$0xff] %v1277_v9  ;;  %v1278_v19 = vmul.f32 0.16666667, %v1021_v10 }
 0x124   :  { %v1279_v20 = vmul.f32 0.16666667, %v1022_v11  ;;  %v767_v21 = vmax.f32 %v511_v12, 0.0  ;;  %v516_v22 = vadd.f32 3.0, %v260_v1  ;;  %v768_v23 = vmax.f32 %v512_v13, 0.0  ;;  %v263_v31 = vld [vmem:[#allocation2 + $0x780] sm:$0xff] }
 0x125   :  { %v769_v24 = vmax.f32 %v513_v14, 0.0  ;;  %v770_v25 = vmax.f32 %v514_v15, 0.0  ;;  %v771_v26 = vmax.f32 %v515_v16, 0.0  ;;  %1534 = vst [vmem:[#allocation5 + $0x730] sm:$0xff] %v1278_v19  ;;  %v517_v29 = vadd.f32 3.0, %v261_v17  ;;  %v264_v32 = vld [vmem:[#allocation2 + $0x788] sm:$0xff] }
 0x126   :  { %1535 = vst [vmem:[#allocation5 + $0x738] sm:$0xff] %v1279_v20  ;;  %v1023_v27 = vmin.f32 %v767_v21, 6.0  ;;  %v772_v28 = vmax.f32 %v516_v22, 0.0  ;;  %v518_v30 = vadd.f32 3.0, %v262_v18  ;;  %v265_v33 = vld [vmem:[#allocation2 + $0x790] sm:$0xff]  ;;  %v1024_v34 = vmin.f32 %v768_v23, 6.0 }
 0x127   :  { %v1025_v35 = vmin.f32 %v769_v24, 6.0  ;;  %v1026_v36 = vmin.f32 %v770_v25, 6.0  ;;  %v1027_v37 = vmin.f32 %v771_v26, 6.0  ;;  %v266_v38 = vld [vmem:[#allocation2 + $0x798] sm:$0xff]  ;;  %v267_v39 = vld [vmem:[#allocation2 + $0x7a0] sm:$0xff]  ;;  %v773_v42 = vmax.f32 %v517_v29, 0.0 }
 0x128   :  { %v1280_v40 = vmul.f32 0.16666667, %v1023_v27  ;;  %v1028_v41 = vmin.f32 %v772_v28, 6.0  ;;  %v774_v43 = vmax.f32 %v518_v30, 0.0  ;;  %v268_v44 = vld [vmem:[#allocation2 + $0x7a8] sm:$0xff]  ;;  %v519_v52 = vadd.f32 3.0, %v263_v31 }
 0x129   :  { %v1281_v45 = vmul.f32 0.16666667, %v1024_v34  ;;  %v1282_v46 = vmul.f32 0.16666667, %v1025_v35  ;;  %v1283_v47 = vmul.f32 0.16666667, %v1026_v36 }
 0x12a   :  { %1536 = vst [vmem:[#allocation5 + $0x740] sm:$0xff] %v1280_v40  ;;  %v1284_v48 = vmul.f32 0.16666667, %v1027_v37  ;;  %v1285_v49 = vmul.f32 0.16666667, %v1028_v41  ;;  %v1029_v50 = vmin.f32 %v773_v42, 6.0 }
 0x12b   :  { %v1030_v51 = vmin.f32 %v774_v43, 6.0  ;;  %1537 = vst [vmem:[#allocation5 + $0x748] sm:$0xff] %v1281_v45  ;;  %1538 = vst [vmem:[#allocation5 + $0x750] sm:$0xff] %v1282_v46  ;;  %v520_v53 = vadd.f32 3.0, %v264_v32  ;;  %v521_v54 = vadd.f32 3.0, %v265_v33  ;;  %v522_v55 = vadd.f32 3.0, %v266_v38 }
 0x12c   :  { %1539 = vst [vmem:[#allocation5 + $0x758] sm:$0xff] %v1283_v47  ;;  %v269_v56 = vld [vmem:[#allocation2 + $0x7b0] sm:$0xff]  ;;  %v270_v57 = vld [vmem:[#allocation2 + $0x7b8] sm:$0xff]  ;;  %1540 = vst [vmem:[#allocation5 + $0x760] sm:$0xff] %v1284_v48  ;;  %v1286_v58 = vmul.f32 0.16666667, %v1029_v50 }
 0x12d   :  { %1541 = vst [vmem:[#allocation5 + $0x768] sm:$0xff] %v1285_v49  ;;  %v1287_v59 = vmul.f32 0.16666667, %v1030_v51  ;;  %v523_v60 = vadd.f32 3.0, %v267_v39  ;;  %v524_v61 = vadd.f32 3.0, %v268_v44  ;;  %v775_v62 = vmax.f32 %v519_v52, 0.0 }
 0x12e   :  { %v776_v63 = vmax.f32 %v520_v53, 0.0  ;;  %v777_v0 = vmax.f32 %v521_v54, 0.0  ;;  %v778_v1 = vmax.f32 %v522_v55, 0.0  ;;  %1542 = vst [vmem:[#allocation5 + $0x770] sm:$0xff] %v1286_v58  ;;  %v525_v4 = vadd.f32 3.0, %v269_v56  ;;  %v271_v6 = vld [vmem:[#allocation2 + $0x7c0] sm:$0xff] }
 0x12f   :  { %1543 = vst [vmem:[#allocation5 + $0x778] sm:$0xff] %v1287_v59  ;;  %v779_v2 = vmax.f32 %v523_v60, 0.0  ;;  %v780_v3 = vmax.f32 %v524_v61, 0.0  ;;  %v526_v5 = vadd.f32 3.0, %v270_v57  ;;  %v272_v7 = vld [vmem:[#allocation2 + $0x7c8] sm:$0xff]  ;;  %v1031_v8 = vmin.f32 %v775_v62, 6.0 }
 0x130   :  { %v1032_v9 = vmin.f32 %v776_v63, 6.0  ;;  %v1033_v10 = vmin.f32 %v777_v0, 6.0  ;;  %v1034_v11 = vmin.f32 %v778_v1, 6.0  ;;  %v273_v12 = vld [vmem:[#allocation2 + $0x7d0] sm:$0xff]  ;;  %v274_v13 = vld [vmem:[#allocation2 + $0x7d8] sm:$0xff]  ;;  %v781_v16 = vmax.f32 %v525_v4, 0.0 }
 0x131   :  { %v1035_v14 = vmin.f32 %v779_v2, 6.0  ;;  %v1036_v15 = vmin.f32 %v780_v3, 6.0  ;;  %v782_v17 = vmax.f32 %v526_v5, 0.0  ;;  %v275_v18 = vld [vmem:[#allocation2 + $0x7e0] sm:$0xff]  ;;  %v276_v19 = vld [vmem:[#allocation2 + $0x7e8] sm:$0xff]  ;;  %v527_v28 = vadd.f32 3.0, %v271_v6 }
 0x132   :  { %v1288_v20 = vmul.f32 0.16666667, %v1031_v8  ;;  %v1289_v21 = vmul.f32 0.16666667, %v1032_v9  ;;  %v1290_v22 = vmul.f32 0.16666667, %v1033_v10 }
 0x133   :  { %v1291_v23 = vmul.f32 0.16666667, %v1034_v11  ;;  %v1292_v24 = vmul.f32 0.16666667, %v1035_v14  ;;  %v1293_v25 = vmul.f32 0.16666667, %v1036_v15 }
 0x134   :  { %1544 = vst [vmem:[#allocation5 + $0x780] sm:$0xff] %v1288_v20  ;;  %1545 = vst [vmem:[#allocation5 + $0x788] sm:$0xff] %v1289_v21  ;;  %v1037_v26 = vmin.f32 %v781_v16, 6.0  ;;  %v1038_v27 = vmin.f32 %v782_v17, 6.0  ;;  %v528_v29 = vadd.f32 3.0, %v272_v7  ;;  %v277_v30 = vld [vmem:[#allocation2 + $0x7f0] sm:$0xff] }
 0x135   :  { %1546 = vst [vmem:[#allocation5 + $0x790] sm:$0xff] %v1290_v22  ;;  %1547 = vst [vmem:[#allocation5 + $0x798] sm:$0xff] %v1291_v23  ;;  %v529_v31 = vadd.f32 3.0, %v273_v12  ;;  %v530_v32 = vadd.f32 3.0, %v274_v13  ;;  %v531_v33 = vadd.f32 3.0, %v275_v18  ;;  %v532_v34 = vadd.f32 3.0, %v276_v19 }
 0x136   :  { %1548 = vst [vmem:[#allocation5 + $0x7a0] sm:$0xff] %v1292_v24  ;;  %1549 = vst [vmem:[#allocation5 + $0x7a8] sm:$0xff] %v1293_v25  ;;  %v278_v35 = vld [vmem:[#allocation2 + $0x7f8] sm:$0xff]  ;;  %v1294_v36 = vmul.f32 0.16666667, %v1037_v26  ;;  %v783_v38 = vmax.f32 %v527_v28, 0.0 }
 0x137   :  { %v1295_v37 = vmul.f32 0.16666667, %v1038_v27  ;;  %v784_v39 = vmax.f32 %v528_v29, 0.0  ;;  %v785_v40 = vmax.f32 %v529_v31, 0.0  ;;  %v786_v41 = vmax.f32 %v530_v32, 0.0  ;;  %s1603_s21 = scalar_lea.vmem %s1566_s20, 32768 }
 0x138   :  { %v787_v42 = vmax.f32 %v531_v33, 0.0  ;;  %v788_v43 = vmax.f32 %v532_v34, 0.0  ;;  %1550 = vst [vmem:[#allocation5 + $0x7b0] sm:$0xff] %v1294_v36  ;;  %v1039_v44 = vmin.f32 %v783_v38, 6.0  ;;  %v533_v46 = vadd.f32 3.0, %v277_v30  ;;  %p1604_p8 = scmp.ne.s32.totalorder %s1566_s20, %s1603_s21  ;;  %p1609_p10 = scmp.lt.s32.totalorder %s1603_s21, %s1603_s21 }
 0x139   :  { %1551 = vst [vmem:[#allocation5 + $0x7b8] sm:$0xff] %v1295_v37  ;;  %v1040_v45 = vmin.f32 %v784_v39, 6.0  ;;  %v534_v47 = vadd.f32 3.0, %v278_v35  ;;  %v1041_v48 = vmin.f32 %v785_v40, 6.0  ;;  %v1042_v49 = vmin.f32 %v786_v41, 6.0 }
 0x13a   :  { %v1043_v50 = vmin.f32 %v787_v42, 6.0  ;;  %v1044_v51 = vmin.f32 %v788_v43, 6.0  ;;  %v1296_v52 = vmul.f32 0.16666667, %v1039_v44  ;;  %v789_v54 = vmax.f32 %v533_v46, 0.0  ;;  %p1610_p11 = por %p1609_p10, %p1608_p9 }
 0x13b   :  { %v1297_v53 = vmul.f32 0.16666667, %v1040_v45  ;;  %v790_v55 = vmax.f32 %v534_v47, 0.0  ;;  %v1298_v56 = vmul.f32 0.16666667, %v1041_v48 }
 0x13c   :  { %v1299_v57 = vmul.f32 0.16666667, %v1042_v49  ;;  %v1300_v58 = vmul.f32 0.16666667, %v1043_v50  ;;  %1552 = vst [vmem:[#allocation5 + $0x7c0] sm:$0xff] %v1296_v52  ;;  %v1045_v60 = vmin.f32 %v789_v54, 6.0  ;;  %p1611_p12 = pnand %p1610_p11, %p1604_p8 }
 0x13d   :  { %1553 = vst [vmem:[#allocation5 + $0x7c8] sm:$0xff] %v1297_v53  ;;  %v1301_v59 = vmul.f32 0.16666667, %v1044_v51  ;;  %v1046_v61 = vmin.f32 %v790_v55, 6.0  ;;  %1554 = vst [vmem:[#allocation5 + $0x7d0] sm:$0xff] %v1298_v56 }
 0x13e   :  { %1555 = vst [vmem:[#allocation5 + $0x7d8] sm:$0xff] %v1299_v57  ;;  %1556 = vst [vmem:[#allocation5 + $0x7e0] sm:$0xff] %v1300_v58  ;;  %v1302_v62 = vmul.f32 0.16666667, %v1045_v60 }
 0x13f   :  { %1557 = vst [vmem:[#allocation5 + $0x7e8] sm:$0xff] %v1301_v59  ;;  %v1303_v63 = vmul.f32 0.16666667, %v1046_v61 }
 0x140   :  { %1558 = vst [vmem:[#allocation5 + $0x7f0] sm:$0xff] %v1302_v62 }
 0x141   :  { %1559 = vst [vmem:[#allocation5 + $0x7f8] sm:$0xff] %v1303_v63 }
 0x142   :  { %1614 = shalt.err (!%p1611_p12)
}
 0x143   :  { %s1615_s24 = scalar_lea.hbm %s1674_s1, 32768 }
 0x144   :  { %p1616_p13 = scmp.ne.s32.totalorder %s1674_s1, %s1615_s24  ;;  %p1619_p0 = scmp.lt.u32.totalorder %s1615_s24, %s1674_s1 }
 0x146   :  { %p1621_p1 = pnand %p1619_p0, %p1616_p13 }
 0x148   :  { %1624 = shalt.err (!%p1621_p1)
}
 0x149   :  { %1571 = dma.vmem_to_hbm [thread:$0]  %s1566_s20, 32768, %s1674_s1, [#allocation4], %s1630_s16, %s1630_s16, %s1631_s17  }
 0x14a   :  { %1627 = dma.done.wait [#allocation4], 32768  }
 0x14b   :  { %1628 = vsyncadd [#allocation4], 4294934528 }
 0x14c   :  { %1575 = vsyncpa [#allocation3], 1 }
 0x14d   :  { %1576 = vsyncpa [#allocation4], 1 }

</bundles_post_ra>
